<compile_context>
chip_gen: v5e
topology: v5e:2x2
jax: 0.10.0
libtpu: 0.0.40
codegen_flags: <defaults>
</compile_context>

<pallas_src>
import jax
import jax.numpy as jnp
from jax.experimental import pallas as pl
from jax.experimental.pallas import tpu as pltpu

B = 16            # total batch per call (small demo; scales up freely)
TB = 8            # batch tile per grid step (fills f32 sublanes)
S = 10            # state_length
C1 = 128          # layer1_shape
L = S - 2         # Conv1d(kernel=3, stride=1, valid) output length = 8
L2 = 128          # layer2_shape
NFC = 3 * C1 * L  # == 3072 == numFcInput

assert B % TB == 0


def critic_kernel(xt_ref, wblk_ref, cb_ref, fw_ref, fb_ref, ow_ref, ob_ref, out_ref):
    """One batch tile (TB states). Weights are VMEM-resident across the grid."""
    xt = xt_ref[...]                                     # [S, TB, 3] f32  (s, b, ch)

    # ---- fused conv branches (lane-dense) -----------------------------------
    # conv[l*TB + b, ch*C1 + c] = relu( sum_k w_ch[c,k] * x[b,ch,l+k] + b_ch[c] )
    # i.e. exactly branchConv_ch[b, c, l] of the torch module, already merged.
    conv = jnp.zeros((L * TB, 3 * C1), jnp.float32)
    for k in range(3):                                   # static unroll, 3 taps
        tap = xt[k:k + L].reshape(L * TB, 3)             # tile-aligned sublane collapse
        conv = conv + jnp.dot(tap, wblk_ref[k],
                              preferred_element_type=jnp.float32)
    conv = jnp.maximum(conv + cb_ref[...], 0.0)          # [L*TB, 3*C1]

    # ---- fc (3072 -> L2): L tile-aligned matmuls, bf16 MXU, f32 accumulate ---
    acc = jnp.zeros((TB, L2), jnp.float32)
    for l in range(L):                                   # static unroll, 8 slabs
        lhs = conv[l * TB:(l + 1) * TB, :].astype(jnp.bfloat16)   # [TB, 3*C1]
        acc = acc + jnp.dot(lhs, fw_ref[l],
                            preferred_element_type=jnp.float32)
    h = jnp.maximum(acc + fb_ref[...], 0.0)              # [TB, L2]

    # ---- critic_output (L2 -> 1): VPU multiply + lane reduce (no N=1 matmul) -
    v = jnp.sum(h * ow_ref[...], axis=-1, keepdims=True) + ob_ref[...]
    out_ref[...] = v                                     # [TB, 1]


@jax.jit
def critic_forward(x, kparams):
    """x: [B, 3, S] (NCW, like the torch module). Returns [B, 1]."""
    wblk, cb, fw3, fb, ow_row, ob = kparams
    bsz = x.shape[0]
    # Layout plumbing only: (b, ch, s) -> (s, b, ch) so the conv window slide is
    # a tile-aligned outer-dim slice inside the kernel.
    xt = jnp.transpose(x, (2, 0, 1))                     # [S, B, 3]
    return pl.pallas_call(
        critic_kernel,
        out_shape=jax.ShapeDtypeStruct((bsz, 1), jnp.float32),
        grid=(bsz // TB,),
        in_specs=[
            pl.BlockSpec((S, TB, 3), lambda i: (0, i, 0)),         # x batch tile
            pl.BlockSpec((3, 3, 3 * C1), lambda i: (0, 0, 0)),     # conv weight (resident)
            pl.BlockSpec((1, 3 * C1), lambda i: (0, 0)),           # conv bias   (resident)
            pl.BlockSpec((L, 3 * C1, L2), lambda i: (0, 0, 0)),    # fc weight bf16 (resident)
            pl.BlockSpec((1, L2), lambda i: (0, 0)),               # fc bias
            pl.BlockSpec((1, L2), lambda i: (0, 0)),               # output weight row
            pl.BlockSpec((1, 1), lambda i: (0, 0)),                # output bias
        ],
        out_specs=pl.BlockSpec((TB, 1), lambda i: (i, 0)),
        compiler_params=pltpu.CompilerParams(
            dimension_semantics=("parallel",)),
    )(xt, wblk, cb, fw3, fb, ow_row, ob)


def make_params(key):
    """Deterministic init mirroring CriticNetwork.init_params() (torch layouts)."""
    ks = jax.random.split(key, 5)
    # Conv1d(1, C1, 3): xavier_uniform on [C1,1,3] (fan_in=3, fan_out=3*C1), bias 0.1
    bound = (6.0 / (1 * 3 + C1 * 3)) ** 0.5
    rw = jax.random.uniform(ks[0], (C1, 3), jnp.float32, -bound, bound)
    dw = jax.random.uniform(ks[1], (C1, 3), jnp.float32, -bound, bound)
    lw = jax.random.uniform(ks[2], (C1, 3), jnp.float32, -bound, bound)
    rb = jnp.full((C1,), 0.1, jnp.float32)
    db = jnp.full((C1,), 0.1, jnp.float32)
    lb = jnp.full((C1,), 0.1, jnp.float32)
    # Linear layers: weight ~ N(0, 0.01), bias 0 (torch layout [out, in]).
    fcw = (0.01 * jax.random.normal(ks[3], (L2, NFC))).astype(jnp.float32)
    fcb = jnp.zeros((L2,), jnp.float32)
    ow = (0.01 * jax.random.normal(ks[4], (1, L2))).astype(jnp.float32)
    ob = jnp.zeros((1,), jnp.float32)
    # The deployed fc weight is bf16 (halves the dominant HBM fetch); the
    # bf16-rounded values are the model's weights for both kernel and reference.
    fcw = fcw.astype(jnp.bfloat16).astype(jnp.float32)
    return (rw, rb, dw, db, lw, lb, fcw, fcb, ow, ob)


def prep_kernel_params(torch_params):
    """Offline layout transforms (pure XLA, done once per model)."""
    rw, rb, dw, db, lw, lb, fcw, fcb, ow, ob = torch_params
    # Block-diagonal conv weight: wblk[k, ch, ch'*C1 + c] = w_ch[c, k] * delta(ch, ch')
    w_all = jnp.stack([rw, dw, lw], axis=0)                       # [ch, C1, k]
    eye3 = jnp.eye(3, dtype=jnp.float32)
    wblk = jnp.einsum('hck,hg->khgc', w_all, eye3).reshape(3, 3, 3 * C1)
    cb = jnp.concatenate([rb, db, lb])[None, :]                   # [1, 3*C1]
    # Fold the torch .view(B,-1)+cat flatten order into the fc weight:
    #   fw3[l, ch*C1 + c, j] = fcw[j, ch*C1*L + c*L + l]
    fw3 = (fcw.T.reshape(3, C1, L, L2)
               .transpose(2, 0, 1, 3)
               .reshape(L, 3 * C1, L2)
               .astype(jnp.bfloat16))
    fb = fcb[None, :]                                             # [1, L2]
    ow_row = ow                                                   # [1, L2]
    ob2 = ob[None, :]                                             # [1, 1]
    return (wblk, cb, fw3, fb, ow_row, ob2)


def reference_forward(x, torch_params):
    """Pure-JAX mirror of the PyTorch forward (f32, torch layouts)."""
    rw, rb, dw, db, lw, lb, fcw, fcb, ow, ob = torch_params
    bsz = x.shape[0]

    def conv_branch(xc, w, b):                                    # xc [B,S], w [C1,3]
        cols = jnp.stack([xc[:, k:k + L] for k in range(3)], axis=-1)      # [B,L,3]
        out = jnp.einsum('blk,ck->bcl', cols, w) + b[None, :, None]        # [B,C1,L]
        return jax.nn.relu(out).reshape(bsz, -1)

    r = conv_branch(x[:, 0, :], rw, rb)
    d = conv_branch(x[:, 1, :], dw, db)
    lo = conv_branch(x[:, 2, :], lw, lb)
    merge = jnp.concatenate([r, d, lo], axis=1)                   # [B, 3072]
    h = jax.nn.relu(merge @ fcw.T + fcb)                          # [B, L2]
    return h @ ow.T + ob                                          # [B, 1]


if __name__ == "__main__":
    key = jax.random.PRNGKey(0)
    pkey, xkey = jax.random.split(key)
    torch_params = make_params(pkey)
    kparams = prep_kernel_params(torch_params)
    x = jax.random.normal(xkey, (B, 3, S), jnp.float32)   # [batch, state_dim, state_length]

    value = jax.block_until_ready(critic_forward(x, kparams))
    ref = jax.block_until_ready(reference_forward(x, torch_params))

    assert value.shape == (B, 1), value.shape
    assert jnp.allclose(value, ref, rtol=5e-2, atol=5e-3), (value, ref)
    print("KERNEL_OK")
</pallas_src>

<mosaic_0001>
module attributes {stable_mosaic.version = 11 : i64} {
  func.func @critic_kernel(%arg0: i32, %arg1: memref<10x8x3xf32, #tpu.memory_space<vmem>>, %arg2: memref<3x3x384xf32, #tpu.memory_space<vmem>>, %arg3: memref<1x384xf32, #tpu.memory_space<vmem>>, %arg4: memref<8x384x128xbf16, #tpu.memory_space<vmem>>, %arg5: memref<1x128xf32, #tpu.memory_space<vmem>>, %arg6: memref<1x128xf32, #tpu.memory_space<vmem>>, %arg7: memref<1x1xf32, #tpu.memory_space<vmem>>, %arg8: memref<8x1xf32, #tpu.memory_space<vmem>>) attributes {dimension_semantics = [#tpu.dimension_semantics<parallel>], iteration_bounds = array<i64: 2>, scalar_prefetch = 0 : i64, scratch_operands = 0 : i64, tpu.core_type = #tpu.core_type<tc>, window_params = [{transform_indices = @transform_0, window_bounds = array<i64: 10, 8, 3>}, {pipeline_mode = #tpu.pipeline_mode<synchronous>, transform_indices = @transform_1, window_bounds = array<i64: 3, 3, 384>}, {pipeline_mode = #tpu.pipeline_mode<synchronous>, transform_indices = @transform_2, window_bounds = array<i64: 1, 384>}, {pipeline_mode = #tpu.pipeline_mode<synchronous>, transform_indices = @transform_3, window_bounds = array<i64: 8, 384, 128>}, {pipeline_mode = #tpu.pipeline_mode<synchronous>, transform_indices = @transform_4, window_bounds = array<i64: 1, 128>}, {pipeline_mode = #tpu.pipeline_mode<synchronous>, transform_indices = @transform_5, window_bounds = array<i64: 1, 128>}, {pipeline_mode = #tpu.pipeline_mode<synchronous>, transform_indices = @transform_6, window_bounds = array<i64: 1, 1>}, {transform_indices = @transform_7, window_bounds = array<i64: 8, 1>}]} {
    %c0 = arith.constant 0 : index
    %c0_0 = arith.constant 0 : index
    %c0_1 = arith.constant 0 : index
    %0 = vector.load %arg1[%c0, %c0_0, %c0_1] : memref<10x8x3xf32, #tpu.memory_space<vmem>>, vector<10x8x3xf32>
    %cst = arith.constant 0.000000e+00 : f32
    %1 = vector.broadcast %cst : f32 to vector<64x384xf32>
    %2 = vector.extract_strided_slice %0 {offsets = [0, 0, 0], sizes = [8, 8, 3], strides = [1, 1, 1]} : vector<10x8x3xf32> to vector<8x8x3xf32>
    %3 = vector.shape_cast %2 : vector<8x8x3xf32> to vector<64x3xf32>
    %c0_2 = arith.constant 0 : index
    %c0_3 = arith.constant 0 : index
    %c0_4 = arith.constant 0 : index
    %4 = vector.load %arg2[%c0_2, %c0_3, %c0_4] : memref<3x3x384xf32, #tpu.memory_space<vmem>>, vector<1x3x384xf32>
    %5 = vector.shape_cast %4 : vector<1x3x384xf32> to vector<3x384xf32>
    %cst_5 = arith.constant dense<0.000000e+00> : vector<64x384xf32>
    %6 = tpu.matmul %3, %5, %cst_5 {dimension_numbers = #tpu.dot_dimension_numbers<[1], [0], [0], [1], [0, 0, 1, 1], [], []>} : vector<64x3xf32>, vector<3x384xf32>, vector<64x384xf32> -> vector<64x384xf32>
    %7 = arith.addf %1, %6 : vector<64x384xf32>
    %8 = vector.extract_strided_slice %0 {offsets = [1, 0, 0], sizes = [8, 8, 3], strides = [1, 1, 1]} : vector<10x8x3xf32> to vector<8x8x3xf32>
    %9 = vector.shape_cast %8 : vector<8x8x3xf32> to vector<64x3xf32>
    %c1 = arith.constant 1 : index
    %c0_6 = arith.constant 0 : index
    %c0_7 = arith.constant 0 : index
    %10 = vector.load %arg2[%c1, %c0_6, %c0_7] : memref<3x3x384xf32, #tpu.memory_space<vmem>>, vector<1x3x384xf32>
    %11 = vector.shape_cast %10 : vector<1x3x384xf32> to vector<3x384xf32>
    %cst_8 = arith.constant dense<0.000000e+00> : vector<64x384xf32>
    %12 = tpu.matmul %9, %11, %cst_8 {dimension_numbers = #tpu.dot_dimension_numbers<[1], [0], [0], [1], [0, 0, 1, 1], [], []>} : vector<64x3xf32>, vector<3x384xf32>, vector<64x384xf32> -> vector<64x384xf32>
    %13 = arith.addf %7, %12 : vector<64x384xf32>
    %14 = vector.extract_strided_slice %0 {offsets = [2, 0, 0], sizes = [8, 8, 3], strides = [1, 1, 1]} : vector<10x8x3xf32> to vector<8x8x3xf32>
    %15 = vector.shape_cast %14 : vector<8x8x3xf32> to vector<64x3xf32>
    %c2 = arith.constant 2 : index
    %c0_9 = arith.constant 0 : index
    %c0_10 = arith.constant 0 : index
    %16 = vector.load %arg2[%c2, %c0_9, %c0_10] : memref<3x3x384xf32, #tpu.memory_space<vmem>>, vector<1x3x384xf32>
    %17 = vector.shape_cast %16 : vector<1x3x384xf32> to vector<3x384xf32>
    %cst_11 = arith.constant dense<0.000000e+00> : vector<64x384xf32>
    %18 = tpu.matmul %15, %17, %cst_11 {dimension_numbers = #tpu.dot_dimension_numbers<[1], [0], [0], [1], [0, 0, 1, 1], [], []>} : vector<64x3xf32>, vector<3x384xf32>, vector<64x384xf32> -> vector<64x384xf32>
    %19 = arith.addf %13, %18 : vector<64x384xf32>
    %c0_12 = arith.constant 0 : index
    %c0_13 = arith.constant 0 : index
    %20 = vector.load %arg3[%c0_12, %c0_13] : memref<1x384xf32, #tpu.memory_space<vmem>>, vector<1x384xf32>
    %21 = vector.broadcast %20 : vector<1x384xf32> to vector<64x384xf32>
    %22 = arith.addf %19, %21 : vector<64x384xf32>
    %cst_14 = arith.constant 0.000000e+00 : f32
    %23 = vector.broadcast %cst_14 : f32 to vector<64x384xf32>
    %24 = arith.maximumf %22, %23 : vector<64x384xf32>
    %cst_15 = arith.constant 0.000000e+00 : f32
    %25 = vector.broadcast %cst_15 : f32 to vector<8x128xf32>
    %26 = vector.extract_strided_slice %24 {offsets = [0, 0], sizes = [8, 384], strides = [1, 1]} : vector<64x384xf32> to vector<8x384xf32>
    %27 = arith.truncf %26 : vector<8x384xf32> to vector<8x384xbf16>
    %c0_16 = arith.constant 0 : index
    %c0_17 = arith.constant 0 : index
    %c0_18 = arith.constant 0 : index
    %28 = vector.load %arg4[%c0_16, %c0_17, %c0_18] : memref<8x384x128xbf16, #tpu.memory_space<vmem>>, vector<1x384x128xbf16>
    %29 = vector.shape_cast %28 : vector<1x384x128xbf16> to vector<384x128xbf16>
    %cst_19 = arith.constant dense<0.000000e+00> : vector<8x128xf32>
    %30 = tpu.matmul %27, %29, %cst_19 {dimension_numbers = #tpu.dot_dimension_numbers<[1], [0], [0], [1], [0, 0, 1, 1], [], []>} : vector<8x384xbf16>, vector<384x128xbf16>, vector<8x128xf32> -> vector<8x128xf32>
    %31 = arith.addf %25, %30 : vector<8x128xf32>
    %32 = vector.extract_strided_slice %24 {offsets = [8, 0], sizes = [8, 384], strides = [1, 1]} : vector<64x384xf32> to vector<8x384xf32>
    %33 = arith.truncf %32 : vector<8x384xf32> to vector<8x384xbf16>
    %c1_20 = arith.constant 1 : index
    %c0_21 = arith.constant 0 : index
    %c0_22 = arith.constant 0 : index
    %34 = vector.load %arg4[%c1_20, %c0_21, %c0_22] : memref<8x384x128xbf16, #tpu.memory_space<vmem>>, vector<1x384x128xbf16>
    %35 = vector.shape_cast %34 : vector<1x384x128xbf16> to vector<384x128xbf16>
    %cst_23 = arith.constant dense<0.000000e+00> : vector<8x128xf32>
    %36 = tpu.matmul %33, %35, %cst_23 {dimension_numbers = #tpu.dot_dimension_numbers<[1], [0], [0], [1], [0, 0, 1, 1], [], []>} : vector<8x384xbf16>, vector<384x128xbf16>, vector<8x128xf32> -> vector<8x128xf32>
    %37 = arith.addf %31, %36 : vector<8x128xf32>
    %38 = vector.extract_strided_slice %24 {offsets = [16, 0], sizes = [8, 384], strides = [1, 1]} : vector<64x384xf32> to vector<8x384xf32>
    %39 = arith.truncf %38 : vector<8x384xf32> to vector<8x384xbf16>
    %c2_24 = arith.constant 2 : index
    %c0_25 = arith.constant 0 : index
    %c0_26 = arith.constant 0 : index
    %40 = vector.load %arg4[%c2_24, %c0_25, %c0_26] : memref<8x384x128xbf16, #tpu.memory_space<vmem>>, vector<1x384x128xbf16>
    %41 = vector.shape_cast %40 : vector<1x384x128xbf16> to vector<384x128xbf16>
    %cst_27 = arith.constant dense<0.000000e+00> : vector<8x128xf32>
    %42 = tpu.matmul %39, %41, %cst_27 {dimension_numbers = #tpu.dot_dimension_numbers<[1], [0], [0], [1], [0, 0, 1, 1], [], []>} : vector<8x384xbf16>, vector<384x128xbf16>, vector<8x128xf32> -> vector<8x128xf32>
    %43 = arith.addf %37, %42 : vector<8x128xf32>
    %44 = vector.extract_strided_slice %24 {offsets = [24, 0], sizes = [8, 384], strides = [1, 1]} : vector<64x384xf32> to vector<8x384xf32>
    %45 = arith.truncf %44 : vector<8x384xf32> to vector<8x384xbf16>
    %c3 = arith.constant 3 : index
    %c0_28 = arith.constant 0 : index
    %c0_29 = arith.constant 0 : index
    %46 = vector.load %arg4[%c3, %c0_28, %c0_29] : memref<8x384x128xbf16, #tpu.memory_space<vmem>>, vector<1x384x128xbf16>
    %47 = vector.shape_cast %46 : vector<1x384x128xbf16> to vector<384x128xbf16>
    %cst_30 = arith.constant dense<0.000000e+00> : vector<8x128xf32>
    %48 = tpu.matmul %45, %47, %cst_30 {dimension_numbers = #tpu.dot_dimension_numbers<[1], [0], [0], [1], [0, 0, 1, 1], [], []>} : vector<8x384xbf16>, vector<384x128xbf16>, vector<8x128xf32> -> vector<8x128xf32>
    %49 = arith.addf %43, %48 : vector<8x128xf32>
    %50 = vector.extract_strided_slice %24 {offsets = [32, 0], sizes = [8, 384], strides = [1, 1]} : vector<64x384xf32> to vector<8x384xf32>
    %51 = arith.truncf %50 : vector<8x384xf32> to vector<8x384xbf16>
    %c4 = arith.constant 4 : index
    %c0_31 = arith.constant 0 : index
    %c0_32 = arith.constant 0 : index
    %52 = vector.load %arg4[%c4, %c0_31, %c0_32] : memref<8x384x128xbf16, #tpu.memory_space<vmem>>, vector<1x384x128xbf16>
    %53 = vector.shape_cast %52 : vector<1x384x128xbf16> to vector<384x128xbf16>
    %cst_33 = arith.constant dense<0.000000e+00> : vector<8x128xf32>
    %54 = tpu.matmul %51, %53, %cst_33 {dimension_numbers = #tpu.dot_dimension_numbers<[1], [0], [0], [1], [0, 0, 1, 1], [], []>} : vector<8x384xbf16>, vector<384x128xbf16>, vector<8x128xf32> -> vector<8x128xf32>
    %55 = arith.addf %49, %54 : vector<8x128xf32>
    %56 = vector.extract_strided_slice %24 {offsets = [40, 0], sizes = [8, 384], strides = [1, 1]} : vector<64x384xf32> to vector<8x384xf32>
    %57 = arith.truncf %56 : vector<8x384xf32> to vector<8x384xbf16>
    %c5 = arith.constant 5 : index
    %c0_34 = arith.constant 0 : index
    %c0_35 = arith.constant 0 : index
    %58 = vector.load %arg4[%c5, %c0_34, %c0_35] : memref<8x384x128xbf16, #tpu.memory_space<vmem>>, vector<1x384x128xbf16>
    %59 = vector.shape_cast %58 : vector<1x384x128xbf16> to vector<384x128xbf16>
    %cst_36 = arith.constant dense<0.000000e+00> : vector<8x128xf32>
    %60 = tpu.matmul %57, %59, %cst_36 {dimension_numbers = #tpu.dot_dimension_numbers<[1], [0], [0], [1], [0, 0, 1, 1], [], []>} : vector<8x384xbf16>, vector<384x128xbf16>, vector<8x128xf32> -> vector<8x128xf32>
    %61 = arith.addf %55, %60 : vector<8x128xf32>
    %62 = vector.extract_strided_slice %24 {offsets = [48, 0], sizes = [8, 384], strides = [1, 1]} : vector<64x384xf32> to vector<8x384xf32>
    %63 = arith.truncf %62 : vector<8x384xf32> to vector<8x384xbf16>
    %c6 = arith.constant 6 : index
    %c0_37 = arith.constant 0 : index
    %c0_38 = arith.constant 0 : index
    %64 = vector.load %arg4[%c6, %c0_37, %c0_38] : memref<8x384x128xbf16, #tpu.memory_space<vmem>>, vector<1x384x128xbf16>
    %65 = vector.shape_cast %64 : vector<1x384x128xbf16> to vector<384x128xbf16>
    %cst_39 = arith.constant dense<0.000000e+00> : vector<8x128xf32>
    %66 = tpu.matmul %63, %65, %cst_39 {dimension_numbers = #tpu.dot_dimension_numbers<[1], [0], [0], [1], [0, 0, 1, 1], [], []>} : vector<8x384xbf16>, vector<384x128xbf16>, vector<8x128xf32> -> vector<8x128xf32>
    %67 = arith.addf %61, %66 : vector<8x128xf32>
    %68 = vector.extract_strided_slice %24 {offsets = [56, 0], sizes = [8, 384], strides = [1, 1]} : vector<64x384xf32> to vector<8x384xf32>
    %69 = arith.truncf %68 : vector<8x384xf32> to vector<8x384xbf16>
    %c7 = arith.constant 7 : index
    %c0_40 = arith.constant 0 : index
    %c0_41 = arith.constant 0 : index
    %70 = vector.load %arg4[%c7, %c0_40, %c0_41] : memref<8x384x128xbf16, #tpu.memory_space<vmem>>, vector<1x384x128xbf16>
    %71 = vector.shape_cast %70 : vector<1x384x128xbf16> to vector<384x128xbf16>
    %cst_42 = arith.constant dense<0.000000e+00> : vector<8x128xf32>
    %72 = tpu.matmul %69, %71, %cst_42 {dimension_numbers = #tpu.dot_dimension_numbers<[1], [0], [0], [1], [0, 0, 1, 1], [], []>} : vector<8x384xbf16>, vector<384x128xbf16>, vector<8x128xf32> -> vector<8x128xf32>
    %73 = arith.addf %67, %72 : vector<8x128xf32>
    %c0_43 = arith.constant 0 : index
    %c0_44 = arith.constant 0 : index
    %74 = vector.load %arg5[%c0_43, %c0_44] : memref<1x128xf32, #tpu.memory_space<vmem>>, vector<1x128xf32>
    %75 = vector.broadcast %74 : vector<1x128xf32> to vector<8x128xf32>
    %76 = arith.addf %73, %75 : vector<8x128xf32>
    %cst_45 = arith.constant 0.000000e+00 : f32
    %77 = vector.broadcast %cst_45 : f32 to vector<8x128xf32>
    %78 = arith.maximumf %76, %77 : vector<8x128xf32>
    %c0_46 = arith.constant 0 : index
    %c0_47 = arith.constant 0 : index
    %79 = vector.load %arg6[%c0_46, %c0_47] : memref<1x128xf32, #tpu.memory_space<vmem>>, vector<1x128xf32>
    %80 = vector.broadcast %79 : vector<1x128xf32> to vector<8x128xf32>
    %81 = arith.mulf %78, %80 : vector<8x128xf32>
    %cst_48 = arith.constant dense<0.000000e+00> : vector<8xf32>
    %82 = vector.multi_reduction <add>, %81, %cst_48 [1] : vector<8x128xf32> to vector<8xf32>
    %83 = vector.shape_cast %82 : vector<8xf32> to vector<8x1xf32>
    %c0_49 = arith.constant 0 : index
    %c0_50 = arith.constant 0 : index
    %84 = vector.load %arg7[%c0_49, %c0_50] : memref<1x1xf32, #tpu.memory_space<vmem>>, vector<1x1xf32>
    %85 = vector.broadcast %84 : vector<1x1xf32> to vector<8x1xf32>
    %86 = arith.addf %83, %85 : vector<8x1xf32>
    %c0_51 = arith.constant 0 : index
    %c0_52 = arith.constant 0 : index
    %87 = vector.load %arg8[%c0_51, %c0_52] : memref<8x1xf32, #tpu.memory_space<vmem>>, vector<8x1xf32>
    tpu.vector_store %arg8[%c0_51, %c0_52], %86 {strides = array<i32>} : memref<8x1xf32, #tpu.memory_space<vmem>>, vector<8x1xf32>,
    return
  }
  func.func @transform_0(%arg0: i32) -> (i32, i32, i32) {
    %c0_i32 = arith.constant 0 : i32
    %c0_i32_0 = arith.constant 0 : i32
    %c0_i32_1 = arith.constant 0 : i32
    return %c0_i32, %arg0, %c0_i32_0 : i32, i32, i32
  }
  func.func @transform_1(%arg0: i32) -> (i32, i32, i32) {
    %c0_i32 = arith.constant 0 : i32
    %c0_i32_0 = arith.constant 0 : i32
    %c0_i32_1 = arith.constant 0 : i32
    %c0_i32_2 = arith.constant 0 : i32
    return %c0_i32, %c0_i32_0, %c0_i32_1 : i32, i32, i32
  }
  func.func @transform_2(%arg0: i32) -> (i32, i32) {
    %c0_i32 = arith.constant 0 : i32
    %c0_i32_0 = arith.constant 0 : i32
    %c0_i32_1 = arith.constant 0 : i32
    return %c0_i32, %c0_i32_0 : i32, i32
  }
  func.func @transform_3(%arg0: i32) -> (i32, i32, i32) {
    %c0_i32 = arith.constant 0 : i32
    %c0_i32_0 = arith.constant 0 : i32
    %c0_i32_1 = arith.constant 0 : i32
    %c0_i32_2 = arith.constant 0 : i32
    return %c0_i32, %c0_i32_0, %c0_i32_1 : i32, i32, i32
  }
  func.func @transform_4(%arg0: i32) -> (i32, i32) {
    %c0_i32 = arith.constant 0 : i32
    %c0_i32_0 = arith.constant 0 : i32
    %c0_i32_1 = arith.constant 0 : i32
    return %c0_i32, %c0_i32_0 : i32, i32
  }
  func.func @transform_5(%arg0: i32) -> (i32, i32) {
    %c0_i32 = arith.constant 0 : i32
    %c0_i32_0 = arith.constant 0 : i32
    %c0_i32_1 = arith.constant 0 : i32
    return %c0_i32, %c0_i32_0 : i32, i32
  }
  func.func @transform_6(%arg0: i32) -> (i32, i32) {
    %c0_i32 = arith.constant 0 : i32
    %c0_i32_0 = arith.constant 0 : i32
    %c0_i32_1 = arith.constant 0 : i32
    return %c0_i32, %c0_i32_0 : i32, i32
  }
  func.func @transform_7(%arg0: i32) -> (i32, i32) {
    %c0_i32 = arith.constant 0 : i32
    %c0_i32_0 = arith.constant 0 : i32
    return %arg0, %c0_i32 : i32, i32
  }
}

</mosaic_0001>

<bundles_post_ra>
// kernel: critic_forward.1
= control target key start
LH: loop header
LB: loop body
LE: loop exit
PB: predicated region body
PF: predicated region fallthrough
CT: control target
= control target key end

     0   :  { %s4555_s0 = inlined_call_operand.vmem [shape: f32[10,16,3], index: 0, kind: input, shape index: {}]   ;;  %s4556_s1 = inlined_call_operand.vmem [shape: f32[3,3,384], index: 1, kind: input, shape index: {}]   ;;  %s4557_s2 = inlined_call_operand.vmem [shape: f32[1,384], index: 2, kind: input, shape index: {}]   ;;  %s4558_s3 = inlined_call_operand.hbm [shape: bf16[8,384,128], index: 3, kind: input, shape index: {}]   ;;  %s4559_s4 = inlined_call_operand.vmem [shape: f32[1,128], index: 4, kind: input, shape index: {}]   ;;  %s4560_s5 = inlined_call_operand.vmem [shape: f32[1,128], index: 5, kind: input, shape index: {}]   ;;  %s4561_s6 = inlined_call_operand.<no memory space> [shape: f32[1,1], index: 6, kind: input, shape index: {}]   ;;  %s4562_s7 = inlined_call_operand.vmem [shape: f32[16,1], index: 7, kind: output, shape index: {}]  }
   0x1   :  { %v12_v0 = vstv %s4561_s6 }
   0x2   :  { %13 = vst [vmem:[#allocation2] sm:$0x1] %v12_v0 }
   0x3   :  { %14 = vsyncpa [#allocation5], 0  ;;  %s4088_s26 = smov 0   ;;  %s4090_s27 = smov 0  }
   0x4   :  { %s4092_s28 = smov 0  }
   0x5 LB: > { %s4104_s6 = sadd.s32 4294967295, %s4040_s28   ;;  %s4107_s29 = sadd.s32 1, %s4040_s28   ;;  %s4040_s28 = sphi %s4092_s28, %s4567_s28   ;;  %s4036_s27 = sphi %s4090_s27, %s4566_s27   ;;  %s4032_s26 = sphi %s4088_s26, %s4565_s26  }
   0x6   : > { %s24_s30 = ssub.s32 %s4040_s28, %s4107_s29  ;;  %s27_s8 = sadd.s32 1, %s4036_s27 }
   0x7   : > { %p25_p0 = scmp.eq.s32.totalorder %s24_s30, 0  ;;  %p34_p1 = scmp.ne.s32.totalorder %s4036_s27, %s4032_s26 }
   0x8   : > { %p35_p2 = scmp.eq.s32.totalorder %s4040_s28, 0  ;;  %p2886_p3 = scmp.ge.s32.totalorder %s4040_s28, 1 }
   0x9   : > { %s4117_s9 = scalar_select %p25_p0, %s4036_s27, %s27_s8  }
   0xa   : > { %p4119_p4 = por %p35_p2, %p34_p1  ;;  %p203_p5 = scmp.lt.s32.totalorder %s4040_s28, 3 }
   0xb   : > { %p3952_p6 = scmp.eq.s32.totalorder %s4104_s6, 0  ;;  %s220_s14 = sshll.u32 %s4558_s3, 4  ;;  %s221_s14 = int_to_ptr.hbm [resolvable:$true] %s220_s14 }
   0xc   : > { %p4125_p7 = pnand %p2886_p3, %p203_p5  ;;  %s4042_s15 = smov [#allocation4]  }
   0xd   : > { %s222_s16 = sshll.u32 %s4042_s15, 4  ;;  %s4043_s17 = smov 64   ;;  %s223_s16 = int_to_ptr.vmem [resolvable:$true] %s222_s16 }
   0xe   : > { %p3948_p8 = pneg %p4125_p7  ;;  %s4044_s18 = smov 4  }
   0xf   : > { %p2888_p10 = scmp.ge.s32.totalorder %s4040_s28, 2 }
  0x10   : > { %p3949_p9 = pnand %p3952_p6, %p3948_p8 }
  0x11   : > { %241 = sbr.rel (%p2888_p10) target bundleno = 36 (0x24), region = 40 }
  0x12   : > { %3951 = dma.hbm_to_vmem [thread:$0]  (!%p3949_p9), %s221_s14, 24576, %s223_s16, [#allocation5], %s4043_s17, %s4043_s17, %s4044_s18  }
  0x16   : > { %244 = sbr.rel (!%p4119_p4) target bundleno = 36 (0x24), region = 44  ;;  %s246_s19 = sand.u32 (%p4119_p4), 1, %s4036_s27  }
  0x17   : > { %s2889_s20 = sshll.u32 (%p4119_p4), %s4040_s28, 3  ;;  %s3942_s21 = smul.u32 (%p4119_p4), 80, %s246_s19 }
  0x18   : > { %s250_s24 = scalar_lea.vmem (%p4119_p4), %s4555_s0, %s2889_s20 }
  0x19   : > { %v297_v1 = vld [vmem:[%s250_s24] sm:$0xff] (%p4119_p4)  ;;  %v299_v2 = vld [vmem:[%s250_s24 + $0x10] sm:$0xff] (%p4119_p4)  ;;  %s248_s25 = scalar_lea.vmem (%p4119_p4), [#allocation3], %s3942_s21 }
  0x1a   : > { %v301_v3 = vld [vmem:[%s250_s24 + $0x20] sm:$0xff] (%p4119_p4)  ;;  %298 = vst [vmem:[%s248_s25] sm:$0xff] (%p4119_p4), %v297_v1  ;;  %v303_v4 = vld [vmem:[%s250_s24 + $0x30] sm:$0xff] (%p4119_p4) }
  0x1b   : > { %300 = vst [vmem:[%s248_s25 + $0x8] sm:$0xff] %v299_v2  ;;  %v305_v5 = vld [vmem:[%s250_s24 + $0x40] sm:$0xff]  ;;  %v307_v6 = vld [vmem:[%s250_s24 + $0x50] sm:$0xff] }
  0x1c   : > { %302 = vst [vmem:[%s248_s25 + $0x10] sm:$0xff] %v301_v3  ;;  %v309_v7 = vld [vmem:[%s250_s24 + $0x60] sm:$0xff]  ;;  %v311_v8 = vld [vmem:[%s250_s24 + $0x70] sm:$0xff] }
  0x1d   : > { %304 = vst [vmem:[%s248_s25 + $0x18] sm:$0xff] %v303_v4  ;;  %v313_v9 = vld [vmem:[%s250_s24 + $0x80] sm:$0xff]  ;;  %v315_v10 = vld [vmem:[%s250_s24 + $0x90] sm:$0xff] }
  0x1e   : > { %306 = vst [vmem:[%s248_s25 + $0x20] sm:$0xff] %v305_v5 }
  0x1f   : > { %308 = vst [vmem:[%s248_s25 + $0x28] sm:$0xff] %v307_v6 }
  0x20   : > { %310 = vst [vmem:[%s248_s25 + $0x30] sm:$0xff] %v309_v7 }
  0x21   : > { %312 = vst [vmem:[%s248_s25 + $0x38] sm:$0xff] %v311_v8 }
  0x22   : > { %314 = vst [vmem:[%s248_s25 + $0x40] sm:$0xff] %v313_v9 }
  0x23   : > { %316 = vst [vmem:[%s248_s25 + $0x48] sm:$0xff] %v315_v10 }
  0x24 PF: > { %325 = sbr.rel (%p4125_p7) target bundleno = 699 (0x2bb), region = 82  ;;  %s328_s28 = sand.u32 (!%p4125_p7), 1, %s4032_s26  }
  0x25   : > { %s3943_s30 = smul.u32 (!%p4125_p7), 80, %s328_s28 }
  0x27   : > { %s4147_s8 = scalar_lea.vmem (!%p4125_p7), [#allocation3], %s3943_s30 }
  0x29   : > { %4027 = dma.done.wait (%p3952_p6), [#allocation5], 24576  }
  0x2a   : > { %4029 = vsyncadd (%p3952_p6), [#allocation5], 4294942720  ;;  %v2893_v11 = vld [vmem:[%s4556_s1 + $0xc] sm:$0x77]  ;;  %v2894_v12 = vld [vmem:[%s4556_s1 + $0x14] sm:$0x7] }
  0x2b   : > { %384 = vst [vmem:[#allocation1] ss:$2 sm:$0xff] %v2893_v11  ;;  %vm415_vm0 = vcmask 1042432   ;;  %v377_v13 = vld [vmem:[%s4556_s1] sm:$0x77]  ;;  %vm390_vm1 = vcmask 23552  }
  0x2c   : > { %386 = vst [vmem:[#allocation1 + $0x10] ss:$2 sm:$0xff] %v2894_v12  ;;  %v4163_v14 = vld [vmem:[%s4147_s8 + $0x8] sm:$0xff]  ;;  %v4166_v15 = vld [vmem:[%s4147_s8 + $0x38] sm:$0xff]  ;;  %v4188_v21 = vld [vmem:[%s4147_s8 + $0x10] sm:$0xff]  ;;  %p363_p11 = scmp.lt.s32.totalorder %s4104_s6, 1 }
  0x2d   : > { %v378_v16 = vld [vmem:[%s4556_s1 + $0x8] sm:$0x7]  ;;  %v2949_v20 = vld [vmem:[%s4556_s1 + $0x18] sm:$0x77]  ;;  %v2950_v26 = vld [vmem:[%s4556_s1 + $0x20] sm:$0x7] }
  0x2e   : > { %v4191_v22 = vld [vmem:[%s4147_s8 + $0x40] sm:$0xff]  ;;  %v4208_v27 = vld [vmem:[%s4147_s8 + $0x18] sm:$0xff]  ;;  %v4226_v30 = vld [vmem:[%s4147_s8 + $0x28] sm:$0xff]  ;;  %s4569_s6 = smov (!%p363_p11, %s4104_s6), 1  ;;  %vm2811_vm2 = vcmask 7168  }
  0x2f   : > { %v367_v28 = vld [vmem:[%s4147_s8] sm:$0xff]  ;;  %v4237_v31 = vld [vmem:[%s4147_s8 + $0x30] sm:$0xff]  ;;  %v4330_v39 = vld [vmem:[%s4147_s8 + $0x48] sm:$0xff]  ;;  %s2892_s30 = sshll.u32 %s4569_s6, 3 }
  0x30   : > { %v371_v29 = vld [vmem:[%s4147_s8 + $0x20] sm:$0xff]  ;;  %v3779_v40 = vld [vmem:[#allocation4 + $0xf8] sm:$0xff]  ;;  %v3777_v47 = vld [vmem:[#allocation4 + $0xe8] sm:$0xff]  ;;  %s366_s12 = scalar_lea.vmem %s4562_s7, %s2892_s30 }
  0x31   : > { %v3787_v41 = vld [vmem:[#allocation4 + $0x138] sm:$0xff]  ;;  %v3778_v45 = vld [vmem:[#allocation4 + $0xf0] sm:$0xff]  ;;  %v3785_v48 = vld [vmem:[#allocation4 + $0x128] sm:$0xff] }
  0x32   : > { %v387_v17 = vld.sshfl [vmem:[#allocation1] sm:$0xff pattern:$0x75316420]  ;;  %v388_v18 = vld.sshfl [vmem:[#allocation1 + $0x8] sm:$0xff pattern:$0x75316420] }
  0x33   : > { %2895 = vmatpush.msk.msra.mxu0 %vm415_vm0, %v387_v17  ;;  %3940 = vmatpush.msk.msra.mxu2 %vm415_vm0, %v387_v17  ;;  %547 = vst [vmem:[#allocation1] ss:$2 sm:$0xff] %v377_v13  ;;  %v389_v19 = vld.sshfl [vmem:[#allocation1 + $0x10] sm:$0xff pattern:$0x75316420]  ;;  %v3786_v46 = vld [vmem:[#allocation4 + $0x130] sm:$0xff] }
  0x34   : > { %2904 = vmatpush.msk.msra.mxu1 %vm415_vm0, %v388_v18  ;;  %3941 = vmatpush.msk.msra.mxu3 %vm415_vm0, %v388_v18  ;;  %549 = vst [vmem:[#allocation1 + $0x10] ss:$2 sm:$0xff] %v378_v16  ;;  %v3803_v49 = vld [vmem:[#allocation4 + $0x1b8] sm:$0xff]  ;;  %v3776_v54 = vld [vmem:[#allocation4 + $0xe0] sm:$0xff]  ;;  %v3802_v56 = vld [vmem:[#allocation4 + $0x1b0] sm:$0xff] }
  0x35   : > { %2896 = vmatmul.msk.f32.vlgmr.msra.gmra.mxu0 %vm390_vm1, %v4163_v14  ;;  %2902 = vmatmul.msk.f32.vlgmr.msra.gmra.mxu2 %vm390_vm1, %v4166_v15  ;;  %v3784_v55 = vld [vmem:[#allocation4 + $0x120] sm:$0xff]  ;;  %v3775_v57 = vld [vmem:[#allocation4 + $0xd8] sm:$0xff]  ;;  %v3801_v59 = vld [vmem:[#allocation4 + $0x1a8] sm:$0xff] }
  0x36   : > { %2905 = vmatmul.msk.f32.vlgmr.msra.gmra.mxu1 %vm390_vm1, %v4163_v14  ;;  %2911 = vmatmul.msk.f32.vlgmr.msra.gmra.mxu3 %vm390_vm1, %v4166_v15  ;;  %v3783_v58 = vld [vmem:[#allocation4 + $0x118] sm:$0xff]  ;;  %v3774_v63 = vld [vmem:[#allocation4 + $0xd0] sm:$0xff]  ;;  %v3800_v1 = vld [vmem:[#allocation4 + $0x1a0] sm:$0xff] }
  0x37   : > { %2913 = vmatpush.msk.msrb.mxu2 %vm415_vm0, %v389_v19  ;;  %v3782_v0 = vld [vmem:[#allocation4 + $0x110] sm:$0xff]  ;;  %v3773_v3 = vld [vmem:[#allocation4 + $0xc8] sm:$0xff]  ;;  %v3799_v5 = vld [vmem:[#allocation4 + $0x198] sm:$0xff] }
  0x38   : > { %v3781_v4 = vld [vmem:[#allocation4 + $0x108] sm:$0xff]  ;;  %v3795_v7 = vld [vmem:[#allocation4 + $0x178] sm:$0xff]  ;;  %v3772_v10 = vld [vmem:[#allocation4 + $0xc0] sm:$0xff] }
  0x39   : > { %v3780_v11 = vld [vmem:[#allocation4 + $0x100] sm:$0xff]  ;;  %v3798_v12 = vld [vmem:[#allocation4 + $0x190] sm:$0xff]  ;;  %v3755_v13 = vld [vmem:[#allocation4 + $0x38] sm:$0xff] }
  0x3a   : > { %v550_v23 = vld.sshfl [vmem:[#allocation1] sm:$0xff pattern:$0x75316420]  ;;  %v551_v24 = vld.sshfl [vmem:[#allocation1 + $0x8] sm:$0xff pattern:$0x75316420] }
  0x3b   : > { %2922 = vmatpush.msk.msrb.mxu3 %vm415_vm0, %v550_v23  ;;  %2931 = vmatpush.msk.msrb.mxu0 %vm415_vm0, %v551_v24  ;;  %690 = vst [vmem:[#allocation1] ss:$2 sm:$0xff] %v2949_v20  ;;  %v552_v25 = vld.sshfl [vmem:[#allocation1 + $0x10] sm:$0xff pattern:$0x75316420]  ;;  %v3754_v18 = vld [vmem:[#allocation4 + $0x30] sm:$0xff] }
  0x3c   : > { %2940 = vmatpush.msk.msrb.mxu1 %vm415_vm0, %v552_v25  ;;  %692 = vst [vmem:[#allocation1 + $0x10] ss:$2 sm:$0xff] %v2950_v26  ;;  %v3797_v17 = vld [vmem:[#allocation4 + $0x188] sm:$0xff]  ;;  %v3762_v19 = vld [vmem:[#allocation4 + $0x70] sm:$0xff]  ;;  %v3796_v24 = vld [vmem:[#allocation4 + $0x180] sm:$0xff] }
  0x3d   : > { %2897 = vmatmul.msk.f32.gmra.mxu0 %vm390_vm1, %v4188_v21  ;;  %2903 = vmatmul.msk.f32.gmra.mxu2 %vm390_vm1, %v4191_v22  ;;  %v3753_v25 = vld [vmem:[#allocation4 + $0x28] sm:$0xff] }
  0x3e   : > { %2906 = vmatmul.msk.f32.gmra.mxu1 %vm390_vm1, %v4188_v21  ;;  %2912 = vmatmul.msk.f32.gmra.mxu3 %vm390_vm1, %v4191_v22  ;;  %v3761_v26 = vld [vmem:[#allocation4 + $0x68] sm:$0xff] }
  0x3f   : > { %1155 = vmatpush.bf16.msra.mxu1 %v3779_v40 }
  0x42   : > { %v693_v32 = vld.sshfl [vmem:[#allocation1] sm:$0xff pattern:$0x75316420]  ;;  %v694_v33 = vld.sshfl [vmem:[#allocation1 + $0x8] sm:$0xff pattern:$0x75316420] }
  0x43   : > { %2951 = vmatpush.msk.msra.mxu2 %vm415_vm0, %v693_v32  ;;  %2960 = vmatpush.msk.msra.mxu3 %vm415_vm0, %v694_v33  ;;  %v695_v34 = vld.sshfl [vmem:[#allocation1 + $0x10] sm:$0xff pattern:$0x75316420] }
  0x44   : > { %2969 = vmatpush.msk.msra.mxu0 %vm415_vm0, %v695_v34  ;;  %1156 = vmatpush.bf16.msra.mxu1 %v3778_v45  ;;  %v3791_v34 = vld [vmem:[#allocation4 + $0x158] sm:$0xff] }
  0x45   : > { %2898 = vmatmul.msk.f32.gmra.mxu0 %vm390_vm1, %v4208_v27  ;;  %2914 = vmatmul.msk.f32.vlgmr.msrb.gmra.mxu2 %vm390_vm1, %v4163_v14  ;;  %v3759_v45 = vld [vmem:[#allocation4 + $0x58] sm:$0xff] }
  0x46   : > { %2907 = vmatmul.msk.f32.gmra.mxu1 %vm390_vm1, %v4208_v27  ;;  %2923 = vmatmul.msk.f32.vlgmr.msrb.gmra.mxu3 %vm390_vm1, %v367_v28 }
  0x47   : > { %1168 = vmatpush.bf16.msrb.mxu2 %v3787_v41  ;;  %1181 = vmatpush.bf16.msrb.mxu3 %v3795_v7  ;;  %v3751_v41 = vld [vmem:[#allocation4 + $0x18] sm:$0xff] }
  0x48   : > { %1157 = vmatpush.bf16.msra.mxu1 %v3777_v47  ;;  %v3790_v47 = vld [vmem:[#allocation4 + $0x150] sm:$0xff] }
  0x4b   : > { %1169 = vmatpush.bf16.msrb.mxu2 %v3786_v46  ;;  %v3833_v46 = vld [vmem:[#allocation4 + $0x2a8] sm:$0xff] }
  0x4c   : > { %1158 = vmatpush.bf16.msra.mxu1 %v3776_v54 }
  0x4d   : > { %2899 = vmatmul.msk.f32.gmra.mxu0 %vm390_vm1, %v371_v29  ;;  %2915 = vmatmul.msk.f32.gmra.mxu2 %vm390_vm1, %v4188_v21 }
  0x4e   : > { %2908 = vmatmul.msk.f32.gmra.mxu1 %vm390_vm1, %v371_v29  ;;  %2924 = vmatmul.msk.f32.gmra.mxu3 %vm390_vm1, %v4163_v14 }
  0x4f   : > { %1170 = vmatpush.bf16.msrb.mxu2 %v3785_v48  ;;  %v3750_v48 = vld [vmem:[#allocation4 + $0x10] sm:$0xff] }
  0x50   : > { %1159 = vmatpush.bf16.msra.mxu1 %v3775_v57 }
  0x53   : > { %1171 = vmatpush.bf16.msrb.mxu2 %v3784_v55  ;;  %v3789_v55 = vld [vmem:[#allocation4 + $0x148] sm:$0xff] }
  0x54   : > { %1160 = vmatpush.bf16.msra.mxu1 %v3774_v63  ;;  %v3831_v63 = vld [vmem:[#allocation4 + $0x298] sm:$0xff] }
  0x55   : > { %2900 = vmatmul.msk.f32.gmra.mxu0 %vm390_vm1, %v4226_v30  ;;  %2916 = vmatmul.msk.f32.gmra.mxu2 %vm390_vm1, %v4208_v27 }
  0x56   : > { %2909 = vmatmul.msk.f32.gmra.mxu1 %vm390_vm1, %v4226_v30  ;;  %2925 = vmatmul.msk.f32.gmra.mxu3 %vm390_vm1, %v4188_v21 }
  0x57   : > { %1172 = vmatpush.bf16.msrb.mxu2 %v3783_v58 }
  0x58   : > { %1161 = vmatpush.bf16.msra.mxu1 %v3773_v3  ;;  %v3748_v3 = vld [vmem:[#allocation4] sm:$0xff] }
  0x5b   : > { %1173 = vmatpush.bf16.msrb.mxu2 %v3782_v0  ;;  %v3788_v0 = vld [vmem:[#allocation4 + $0x140] sm:$0xff] }
  0x5c   : > { %1162 = vmatpush.bf16.msra.mxu1 %v3772_v10 }
  0x5d   : > { %2901 = vmatmul.msk.f32.gmra.mxu0 %vm390_vm1, %v4237_v31  ;;  %2917 = vmatmul.msk.f32.gmra.mxu2 %vm390_vm1, %v371_v29 }
  0x5e   : > { %2910 = vmatmul.msk.f32.gmra.mxu1 %vm390_vm1, %v4237_v31  ;;  %2926 = vmatmul.msk.f32.gmra.mxu3 %vm390_vm1, %v4208_v27 }
  0x5f   : > { %1174 = vmatpush.bf16.msrb.mxu2 %v3781_v4  ;;  %v3756_v4 = vld [vmem:[#allocation4 + $0x40] sm:$0xff] }
  0x63   : > { %1175 = vmatpush.bf16.msrb.mxu2 %v3780_v11 }
  0x65   : > { %2918 = vmatmul.msk.f32.gmra.mxu2 %vm390_vm1, %v4226_v30  ;;  %2932 = vmatmul.msk.f32.vlgmr.msrb.gmra.mxu0 %vm390_vm1, %v367_v28 }
  0x66   : > { %2927 = vmatmul.msk.f32.gmra.mxu3 %vm390_vm1, %v371_v29  ;;  %2941 = vmatmul.msk.f32.vlgmr.msrb.gmra.mxu1 %vm390_vm1, %v367_v28  ;;  %v3792_v28 = vld [vmem:[#allocation4 + $0x160] sm:$0xff] }
  0x67   : > { %1573 = vmatpush.bf16.msrb.mxu0 %v3803_v49  ;;  %1338 = vmatpush.bf16.msrb.mxu1 %v3755_v13  ;;  %v3758_v49 = vld [vmem:[#allocation4 + $0x50] sm:$0xff] }
  0x68   : > { %v3770_v13 = vld [vmem:[#allocation4 + $0xb0] sm:$0xff] }
  0x6b   : > { %1574 = vmatpush.bf16.msrb.mxu0 %v3802_v56  ;;  %1339 = vmatpush.bf16.msrb.mxu1 %v3754_v18 }
  0x6d   : > { %2919 = vmatmul.msk.f32.gmra.mxu2 %vm390_vm1, %v4237_v31  ;;  %2933 = vmatmul.msk.f32.gmra.mxu0 %vm390_vm1, %v4163_v14 }
  0x6e   : > { %2928 = vmatmul.msk.f32.gmra.mxu3 %vm390_vm1, %v4226_v30  ;;  %2942 = vmatmul.msk.f32.gmra.mxu1 %vm390_vm1, %v4163_v14  ;;  %v3763_v14 = vld [vmem:[#allocation4 + $0x78] sm:$0xff] }
  0x6f   : > { %1575 = vmatpush.bf16.msrb.mxu0 %v3801_v59  ;;  %1340 = vmatpush.bf16.msrb.mxu1 %v3753_v25  ;;  %v3749_v59 = vld [vmem:[#allocation4 + $0x8] sm:$0xff]  ;;  %v3768_v25 = vld [vmem:[#allocation4 + $0xa0] sm:$0xff] }
  0x73   : > { %1576 = vmatpush.bf16.msrb.mxu0 %v3800_v1  ;;  %v3771_v1 = vld [vmem:[#allocation4 + $0xb8] sm:$0xff] }
  0x75   : > { %2920 = vmatmul.msk.f32.gmra.mxu2 %vm390_vm1, %v4166_v15  ;;  %2934 = vmatmul.msk.f32.gmra.mxu0 %vm390_vm1, %v4188_v21 }
  0x76   : > { %2929 = vmatmul.msk.f32.gmra.mxu3 %vm390_vm1, %v4237_v31  ;;  %2943 = vmatmul.msk.f32.gmra.mxu1 %vm390_vm1, %v4188_v21 }
  0x77   : > { %1577 = vmatpush.bf16.msrb.mxu0 %v3799_v5  ;;  %v3830_v5 = vld [vmem:[#allocation4 + $0x290] sm:$0xff] }
  0x7b   : > { %1578 = vmatpush.bf16.msrb.mxu0 %v3798_v12 }
  0x7d   : > { %2921 = vmatmul.msk.f32.gmra.mxu2 %vm390_vm1, %v4191_v22  ;;  %2935 = vmatmul.msk.f32.gmra.mxu0 %vm390_vm1, %v4208_v27 }
  0x7e   : > { %2930 = vmatmul.msk.f32.gmra.mxu3 %vm390_vm1, %v4166_v15  ;;  %2944 = vmatmul.msk.f32.gmra.mxu1 %vm390_vm1, %v4208_v27 }
  0x7f   : > { %1579 = vmatpush.bf16.msrb.mxu0 %v3797_v17  ;;  %v3769_v17 = vld [vmem:[#allocation4 + $0xa8] sm:$0xff] }
  0x83   : > { %1580 = vmatpush.bf16.msrb.mxu0 %v3796_v24 }
  0x85   : > { %2936 = vmatmul.msk.f32.gmra.mxu0 %vm390_vm1, %v371_v29  ;;  %2952 = vmatmul.msk.f32.vlgmr.msra.gmra.mxu2 %vm390_vm1, %v4188_v21 }
  0x86   : > { %2945 = vmatmul.msk.f32.gmra.mxu1 %vm390_vm1, %v371_v29  ;;  %2961 = vmatmul.msk.f32.vlgmr.msra.gmra.mxu3 %vm390_vm1, %v4188_v21 }
  0x87   : > { %1351 = vmatpush.bf16.msra.mxu2 %v3763_v14 }
  0x8b   : > { %1352 = vmatpush.bf16.msra.mxu2 %v3762_v19  ;;  %v3828_v19 = vld [vmem:[#allocation4 + $0x280] sm:$0xff] }
  0x8d   : > { %2937 = vmatmul.msk.f32.gmra.mxu0 %vm390_vm1, %v4226_v30  ;;  %2953 = vmatmul.msk.f32.gmra.mxu2 %vm390_vm1, %v4208_v27 }
  0x8e   : > { %2946 = vmatmul.msk.f32.gmra.mxu1 %vm390_vm1, %v4226_v30  ;;  %2962 = vmatmul.msk.f32.gmra.mxu3 %vm390_vm1, %v4208_v27 }
  0x8f   : > { %1353 = vmatpush.bf16.msra.mxu2 %v3761_v26 }
  0x95   : > { %2938 = vmatmul.msk.f32.gmra.mxu0 %vm390_vm1, %v4237_v31  ;;  %2954 = vmatmul.msk.f32.gmra.mxu2 %vm390_vm1, %v371_v29 }
  0x96   : > { %2947 = vmatmul.msk.f32.gmra.mxu1 %vm390_vm1, %v4237_v31  ;;  %2963 = vmatmul.msk.f32.gmra.mxu3 %vm390_vm1, %v371_v29 }
  0x9d   : > { %2939 = vmatmul.msk.f32.gmra.mxu0 %vm390_vm1, %v4166_v15  ;;  %2955 = vmatmul.msk.f32.gmra.mxu2 %vm390_vm1, %v4226_v30 }
  0x9e   : > { %2948 = vmatmul.msk.f32.gmra.mxu1 %vm390_vm1, %v4166_v15  ;;  %2964 = vmatmul.msk.f32.gmra.mxu3 %vm390_vm1, %v4226_v30 }
  0xa5   : > { %2956 = vmatmul.msk.f32.gmra.mxu2 %vm390_vm1, %v4237_v31  ;;  %2970 = vmatmul.msk.f32.vlgmr.msra.gmra.mxu0 %vm390_vm1, %v4188_v21  ;;  %v3793_v21 = vld [vmem:[#allocation4 + $0x168] sm:$0xff] }
  0xa6   : > { %2965 = vmatmul.msk.f32.gmra.mxu3 %vm390_vm1, %v4237_v31 }
  0xad   : > { %2957 = vmatmul.msk.f32.gmra.mxu2 %vm390_vm1, %v4166_v15  ;;  %2971 = vmatmul.msk.f32.gmra.mxu0 %vm390_vm1, %v4208_v27  ;;  %v3835_v27 = vld [vmem:[#allocation4 + $0x2b8] sm:$0xff] }
  0xae   : > { %2966 = vmatmul.msk.f32.gmra.mxu3 %vm390_vm1, %v4166_v15  ;;  %1822 = vmatpush.bf16.msra.mxu0 %v3835_v27  ;;  %v3767_v27 = vld [vmem:[#allocation4 + $0x98] sm:$0xff] }
  0xb2   : > { %v439_v35 = vpop.f32.mrf.mxu0 }
  0xb3   : > { %v4360_v2 = vpop.f32.mrf.mxu1 }
  0xb5   : > { %2958 = vmatmul.msk.f32.gmra.mxu2 %vm390_vm1, %v4191_v22  ;;  %2972 = vmatmul.msk.f32.gmra.mxu0 %vm390_vm1, %v371_v29  ;;  %v3752_v29 = vld [vmem:[#allocation4 + $0x20] sm:$0xff] }
  0xb6   : > { %2967 = vmatmul.msk.f32.gmra.mxu3 %vm390_vm1, %v4191_v22  ;;  %1341 = vmatpush.bf16.msrb.mxu1 %v3752_v29 }
  0xb8   : > { %v4323_v36 = vpop.f32.mrf.mxu2 }
  0xb9   : > { %v4325_v37 = vpop.f32.mrf.mxu3 }
  0xba   : > { %v4327_v38 = vpop.f32.mrf.mxu0  ;;  %1342 = vmatpush.bf16.msrb.mxu1 %v3751_v41  ;;  %v3765_v41 = vld [vmem:[#allocation4 + $0x88] sm:$0xff] }
  0xbb   : > { %v4372_v16 = vpop.f32.mrf.mxu1 }
  0xbd   : > { %2959 = vmatmul.msk.f32.gmra.mxu2 %vm390_vm1, %v4330_v39  ;;  %2973 = vmatmul.msk.f32.gmra.mxu0 %vm390_vm1, %v4226_v30  ;;  %v3760_v30 = vld [vmem:[#allocation4 + $0x60] sm:$0xff] }
  0xbe   : > { %2968 = vmatmul.msk.f32.gmra.mxu3 %vm390_vm1, %v4330_v39  ;;  %1354 = vmatpush.bf16.msra.mxu2 %v3760_v30 }
  0xbf   : > { %1343 = vmatpush.bf16.msrb.mxu1 %v3750_v48 }
  0xc0   : > { %v4338_v42 = vpop.f32.mrf.mxu2 }
  0xc1   : > { %v4340_v43 = vpop.f32.mrf.mxu3 }
  0xc2   : > { %v4342_v44 = vpop.f32.mrf.mxu0  ;;  %1355 = vmatpush.bf16.msra.mxu2 %v3759_v45 }
  0xc3   : > { %v4380_v32 = vpop.f32.mrf.mxu1  ;;  %1344 = vmatpush.bf16.msrb.mxu1 %v3749_v59 }
  0xc5   : > { %2974 = vmatmul.msk.f32.gmra.mxu0 %vm390_vm1, %v4237_v31  ;;  %v3834_v31 = vld [vmem:[#allocation4 + $0x2b0] sm:$0xff] }
  0xc6   : > { %1823 = vmatpush.bf16.msra.mxu0 %v3834_v31  ;;  %1356 = vmatpush.bf16.msra.mxu2 %v3758_v49  ;;  %v3766_v31 = vld [vmem:[#allocation4 + $0x90] sm:$0xff] }
  0xc7   : > { %1345 = vmatpush.bf16.msrb.mxu1 %v3748_v3 }
  0xc8   : > { %v4346_v50 = vpop.f32.mrf.mxu2 }
  0xc9   : > { %v579_v51 = vpop.f32.mrf.mxu3 }
  0xca   : > { %v4348_v52 = vadd.f32 %v579_v51, %v439_v35  ;;  %v4350_v53 = vpop.f32.mrf.mxu0  ;;  %1824 = vmatpush.bf16.msra.mxu0 %v3833_v46  ;;  %v3832_v51 = vld [vmem:[#allocation4 + $0x2a0] sm:$0xff] }
  0xcb   : > { %v4393_v57 = vpop.f32.mrf.mxu1 }
  0xcd   : > { %2975 = vmatmul.msk.f32.gmra.mxu0 %vm390_vm1, %v4166_v15  ;;  %v3794_v15 = vld [vmem:[#allocation4 + $0x170] sm:$0xff] }
  0xce   : > { %1182 = vmatpush.bf16.msrb.mxu3 %v3794_v15  ;;  %1825 = vmatpush.bf16.msra.mxu0 %v3832_v51  ;;  %v3829_v15 = vld [vmem:[#allocation4 + $0x288] sm:$0xff] }
  0xd0   : > { %v4354_v60 = vpop.f32.mrf.mxu2 }
  0xd1   : > { %v4356_v61 = vpop.f32.mrf.mxu3 }
  0xd2   : > { %v4358_v62 = vpop.f32.mrf.mxu0  ;;  %1183 = vmatpush.bf16.msrb.mxu3 %v3793_v21  ;;  %1826 = vmatpush.bf16.msra.mxu0 %v3831_v63  ;;  %v583_v45 = vadd.f32 %v4356_v61, %v4327_v38 }
  0xd3   : > { %v492_v14 = vpop.f32.mrf.mxu1 }
  0xd5   : > { %2976 = vmatmul.msk.f32.gmra.mxu0 %vm390_vm1, %v4191_v22 }
  0xd6   : > { %1184 = vmatpush.bf16.msrb.mxu3 %v3792_v28  ;;  %1827 = vmatpush.bf16.msra.mxu0 %v3830_v5  ;;  %v3819_v5 = vld [vmem:[#allocation4 + $0x238] sm:$0xff] }
  0xd8   : > { %v4364_v6 = vpop.f32.mrf.mxu2 }
  0xd9   : > { %v4366_v8 = vpop.f32.mrf.mxu3 }
  0xda   : > { %v4368_v9 = vpop.f32.mrf.mxu0  ;;  %1185 = vmatpush.bf16.msrb.mxu3 %v3791_v34  ;;  %1828 = vmatpush.bf16.msra.mxu0 %v3829_v15  ;;  %v586_v3 = vadd.f32 %v4366_v8, %v4342_v44  ;;  %v3818_v8 = vld [vmem:[#allocation4 + $0x230] sm:$0xff] }
  0xdb   : > { %v495_v26 = vpop.f32.mrf.mxu1 }
  0xdd   : > { %2977 = vmatmul.msk.f32.gmra.mxu0 %vm390_vm1, %v4330_v39 }
  0xde   : > { %1186 = vmatpush.bf16.msrb.mxu3 %v3790_v47  ;;  %1829 = vmatpush.bf16.msra.mxu0 %v3828_v19 }
  0xe0   : > { %v4374_v20 = vpop.f32.mrf.mxu2 }
  0xe1   : > { %v4376_v22 = vpop.f32.mrf.mxu3 }
  0xe2   : > { %v4378_v23 = vpop.f32.mrf.mxu0  ;;  %1187 = vmatpush.bf16.msrb.mxu3 %v3789_v55 }
  0xe3   : > { %v4419_v46 = vpop.f32.mrf.mxu1 }
  0xe6   : > { %1188 = vmatpush.bf16.msrb.mxu3 %v3788_v0  ;;  %v3764_v0 = vld [vmem:[#allocation4 + $0x80] sm:$0xff] }
  0xe8   : > { %v4382_v33 = vpop.f32.mrf.mxu2 }
  0xe9   : > { %v591_v35 = vpop.f32.mrf.mxu3 }
  0xea   : > { %v4385_v39 = vadd.f32 %v591_v35, %v4358_v62  ;;  %v4387_v40 = vpop.f32.mrf.mxu0  ;;  %v3757_v62 = vld [vmem:[#allocation4 + $0x48] sm:$0xff]  ;;  %1364 = vmatpush.bf16.msra.mxu3 %v3771_v1  ;;  %v4415_v35 = vld [vmem:[%s4557_s2] sm:$0x7] }
  0xeb   : > { %1357 = vmatpush.bf16.msra.mxu2 %v3757_v62  ;;  %v624_v47 = vadd.f32 %v4387_v40, %v4372_v16  ;;  %v4424_v49 = vperm.slane %v4415_v35, 0  ;;  %v4427_v59 = vperm.slane %v4415_v35, 1  ;;  %v3811_v1 = vld [vmem:[#allocation4 + $0x1f8] sm:$0xff]  ;;  %v664_v19 = vpop.f32.mrf.mxu1 }
  0xee   : > { %1365 = vmatpush.bf16.msra.mxu3 %v3770_v13 }
  0xef   : > { %1358 = vmatpush.bf16.msra.mxu2 %v3756_v4 }
  0xf0   : > { %v4389_v54 = vpop.f32.mrf.mxu2 }
  0xf1   : > { %v4391_v56 = vpop.f32.mrf.mxu3 }
  0xf2   : > { %v4395_v58 = vpop.f32.mrf.mxu0  ;;  %1366 = vmatpush.bf16.msra.mxu3 %v3769_v17  ;;  %v621_v17 = vadd.f32 %v4378_v23, %v4360_v2  ;;  %v3817_v23 = vld [vmem:[#allocation4 + $0x228] sm:$0xff] }
  0xf6   : > { %1367 = vmatpush.bf16.msra.mxu3 %v3768_v25  ;;  %v3810_v25 = vld [vmem:[#allocation4 + $0x1f0] sm:$0xff] }
  0xf8   : > { %v4397_v7 = vpop.f32.mrf.mxu2 }
  0xf9   : > { %v597_v10 = vpop.f32.mrf.mxu3 }
  0xfa   : > { %v4400_v11 = vadd.f32 %v597_v10, %v4323_v36  ;;  %v4402_v12 = vpop.f32.mrf.mxu0  ;;  %1368 = vmatpush.bf16.msra.mxu3 %v3767_v27 }
  0xfe   : > { %1369 = vmatpush.bf16.msra.mxu3 %v3766_v31  ;;  %v3809_v31 = vld [vmem:[#allocation4 + $0x1e8] sm:$0xff] }
 0x100   : > { %v4404_v18 = vpop.f32.mrf.mxu2 }
 0x101   : > { %v4406_v21 = vpop.f32.mrf.mxu3 }
 0x102   : > { %v632_v24 = vpop.f32.mrf.mxu0  ;;  %1370 = vmatpush.bf16.msra.mxu3 %v3765_v41  ;;  %v3867_v41 = vld [vmem:[#allocation4 + $0x3b8] sm:$0xff] }
 0x103   : > { %v4408_v36 = vadd.f32 %v632_v24, %v492_v14 }
 0x106   : > { %1371 = vmatpush.bf16.msra.mxu3 %v3764_v0 }
 0x108   : > { %v722_v28 = vpop.f32.mrf.mxu2 }
 0x109   : > { %v763_v29 = vpop.f32.mrf.mxu3 }
 0x10a   : > { %v635_v30 = vpop.f32.mrf.mxu0  ;;  %v829_v27 = vadd.f32 %v763_v29, %v621_v17 }
 0x10b   : > { %v4410_v34 = vadd.f32 %v635_v30, %v495_v26  ;;  %v828_v26 = vadd.f32 %v722_v28, %v4348_v52  ;;  %v630_v52 = vadd.f32 %v4402_v12, %v4393_v57  ;;  %v3815_v12 = vld [vmem:[#allocation4 + $0x218] sm:$0xff] }
 0x110   : > { %v725_v48 = vpop.f32.mrf.mxu2 }
 0x111   : > { %v831_v51 = vadd.f32 %v725_v48, %v583_v45  ;;  %v766_v55 = vpop.f32.mrf.mxu3  ;;  %v860_v45 = vadd.f32 %v4424_v49, %v828_v26 }
 0x112   : > { %v832_v62 = vadd.f32 %v766_v55, %v624_v47  ;;  %v4429_v63 = vpop.f32.mrf.mxu0  ;;  %v861_v47 = vadd.f32 %v4427_v59, %v829_v27  ;;  %v3866_v55 = vld [vmem:[#allocation4 + $0x3b0] sm:$0xff] }
 0x113   : > { %v863_v38 = vadd.f32 %v4424_v49, %v831_v51  ;;  %v3808_v51 = vld [vmem:[#allocation4 + $0x1e0] sm:$0xff] }
 0x114   : > { %v864_v61 = vadd.f32 %v4427_v59, %v832_v62  ;;  %v884_v62 = vmax.f32 %v860_v45, 0.0 }
 0x115   : > { %v887_v16 = vmax.f32 %v863_v38, 0.0  ;;  %v3816_v38 = vld [vmem:[#allocation4 + $0x220] sm:$0xff] }
 0x116   : > { %v888_v40 = vmax.f32 %v864_v61, 0.0  ;;  %v667_v61 = vpop.f32.mrf.mxu1 }
 0x117   : > { %v959_v4 = vpack.c.bf16 %v887_v16, %v887_v16  ;;  %v885_v16 = vmax.f32 %v861_v47, 0.0  ;;  %v3863_v47 = vld [vmem:[#allocation4 + $0x398] sm:$0xff] }
 0x118   : > { %v960_v10 = vpack.c.bf16 %v888_v40, %v888_v40  ;;  %v728_v13 = vpop.f32.mrf.mxu2  ;;  %v3807_v40 = vld [vmem:[#allocation4 + $0x1d8] sm:$0xff] }
 0x119   : > { %v834_v14 = vadd.f32 %v728_v13, %v586_v3  ;;  %v769_v15 = vpop.f32.mrf.mxu3  ;;  %1163 = vmatmul.bf16.vlgmr.msra.gmra.mxu1 %v959_v4  ;;  %v3865_v3 = vld [vmem:[#allocation4 + $0x3a8] sm:$0xff]  ;;  %v909_v4 = vpack.c.bf16 %v885_v16, %v885_v16  ;;  %v627_v13 = vadd.f32 %v4395_v58, %v4380_v32  ;;  %v3864_v58 = vld [vmem:[#allocation4 + $0x3a0] sm:$0xff] }
 0x11a   : > { %1176 = vmatmul.bf16.vlgmr.msrb.gmra.mxu2 %v960_v10  ;;  %1586 = vmatpush.bf16.msra.mxu1 %v3811_v1  ;;  %v4437_v24 = vpop.f32.mrf.mxu0  ;;  %v908_v1 = vpack.c.bf16 %v884_v62, %v884_v62  ;;  %v665_v10 = vadd.f32 %v664_v19, %v4354_v60 }
 0x11b   : > { %v866_v44 = vadd.f32 %v4424_v49, %v834_v14  ;;  %1599 = vmatpush.bf16.msrb.mxu2 %v3819_v5  ;;  %v835_v27 = vadd.f32 %v769_v15, %v627_v13  ;;  %v595_v15 = vadd.f32 %v4391_v56, %v4368_v9  ;;  %v3804_v56 = vld [vmem:[#allocation4 + $0x1c0] sm:$0xff] }
 0x11d   : > { %v890_v30 = vmax.f32 %v866_v44, 0.0 }
 0x11e   : > { %1587 = vmatpush.bf16.msra.mxu1 %v3810_v25  ;;  %v4455_v25 = vperm.slane %v4415_v35, 2 }
 0x11f   : > { %v1377_v2 = vpack.c.bf16 %v890_v30, %v890_v30  ;;  %1600 = vmatpush.bf16.msrb.mxu2 %v3818_v8  ;;  %v3806_v8 = vld [vmem:[#allocation4 + $0x1d0] sm:$0xff] }
 0x120   : > { %v4443_v48 = vpop.f32.mrf.mxu2 }
 0x121   : > { %v772_v28 = vpop.f32.mrf.mxu3  ;;  %1581 = vmatmul.bf16.vlgmr.msrb.gmra.mxu0 %v1377_v2 }
 0x122   : > { %1588 = vmatpush.bf16.msra.mxu1 %v3809_v31  ;;  %2071 = vmatpush.bf16.msrb.mxu0 %v3867_v41  ;;  %v4447_v29 = vpop.f32.mrf.mxu0  ;;  %v838_v0 = vadd.f32 %v772_v28, %v630_v52  ;;  %v3805_v31 = vld [vmem:[#allocation4 + $0x1c8] sm:$0xff]  ;;  %v867_v41 = vadd.f32 %v4427_v59, %v835_v27  ;;  %v668_v28 = vadd.f32 %v667_v61, %v4364_v6  ;;  %v3843_v61 = vld [vmem:[#allocation4 + $0x2f8] sm:$0xff] }
 0x123   : > { %1601 = vmatpush.bf16.msrb.mxu2 %v3817_v23  ;;  %v3813_v23 = vld [vmem:[#allocation4 + $0x208] sm:$0xff] }
 0x124   : > { %v870_v57 = vadd.f32 %v4427_v59, %v838_v0  ;;  %v3827_v0 = vld [vmem:[#allocation4 + $0x278] sm:$0xff]  ;;  %v891_v16 = vmax.f32 %v867_v41, 0.0 }
 0x125   : > { %v3899_v41 = vld [vmem:[#allocation4 + $0x4b8] sm:$0xff] }
 0x126   : > { %1589 = vmatpush.bf16.msra.mxu1 %v3808_v51  ;;  %2072 = vmatpush.bf16.msrb.mxu0 %v3866_v55  ;;  %v894_v30 = vmax.f32 %v870_v57, 0.0  ;;  %v3812_v57 = vld [vmem:[#allocation4 + $0x200] sm:$0xff] }
 0x127   : > { %1602 = vmatpush.bf16.msrb.mxu2 %v3816_v38 }
 0x128   : > { %v734_v5 = vpop.f32.mrf.mxu2  ;;  %v1614_v45 = vpack.c.bf16 %v894_v30, %v894_v30 }
 0x129   : > { %v840_v14 = vadd.f32 %v734_v5, %v4385_v39  ;;  %v775_v17 = vpop.f32.mrf.mxu3  ;;  %1346 = vmatmul.bf16.vlgmr.msrb.gmra.mxu1 %v908_v1  ;;  %v3814_v39 = vld [vmem:[#allocation4 + $0x210] sm:$0xff] }
 0x12a   : > { %v841_v26 = vadd.f32 %v775_v17, %v4408_v36  ;;  %1359 = vmatmul.bf16.vlgmr.msra.gmra.mxu2 %v909_v4  ;;  %1590 = vmatpush.bf16.msra.mxu1 %v3807_v40  ;;  %v807_v44 = vpop.f32.mrf.mxu0  ;;  %v4465_v36 = vpop.f32.mrf.mxu1  ;;  %v3826_v5 = vld [vmem:[#allocation4 + $0x270] sm:$0xff]  ;;  %v3861_v17 = vld [vmem:[#allocation4 + $0x388] sm:$0xff] }
 0x12b   : > { %v4459_v60 = vadd.f32 %v4424_v49, %v840_v14  ;;  %1603 = vmatpush.bf16.msrb.mxu2 %v3815_v12  ;;  %2073 = vmatpush.bf16.msrb.mxu0 %v3865_v3  ;;  %v833_v32 = vadd.f32 %v807_v44, %v665_v10  ;;  %v3862_v12 = vld [vmem:[#allocation4 + $0x390] sm:$0xff]  ;;  %v3851_v3 = vld [vmem:[#allocation4 + $0x338] sm:$0xff]  ;;  %v1378_v10 = vpack.c.bf16 %v891_v16, %v891_v16 }
 0x12c   : > { %v4462_v19 = vadd.f32 %v4427_v59, %v841_v26  ;;  %v639_v44 = vadd.f32 %v4429_v63, %v4325_v37  ;;  %v3860_v37 = vld [vmem:[#allocation4 + $0x380] sm:$0xff] }
 0x12d   : > { %v865_v35 = vadd.f32 %v4455_v25, %v833_v32 }
 0x12e   : > { %1591 = vmatpush.bf16.msra.mxu1 %v3806_v8 }
 0x12f   : > { %v889_v2 = vmax.f32 %v865_v35, 0.0  ;;  %1604 = vmatpush.bf16.msrb.mxu2 %v3814_v39  ;;  %2074 = vmatpush.bf16.msrb.mxu0 %v3864_v58 }
 0x130   : > { %v737_v52 = vpop.f32.mrf.mxu2 }
 0x131   : > { %v961_v51 = vpack.c.bf16 %v889_v2, %v889_v2  ;;  %v843_v55 = vadd.f32 %v737_v52, %v595_v15  ;;  %v778_v62 = vpop.f32.mrf.mxu3  ;;  %1830 = vmatmul.bf16.vlgmr.msra.gmra.mxu0 %v1614_v45  ;;  %v3841_v15 = vld [vmem:[#allocation4 + $0x2e8] sm:$0xff]  ;;  %v3824_v45 = vld [vmem:[#allocation4 + $0x260] sm:$0xff]  ;;  %v601_v2 = vadd.f32 %v4406_v21, %v4338_v42  ;;  %v3823_v21 = vld [vmem:[#allocation4 + $0x258] sm:$0xff] }
 0x132   : > { %v844_v38 = vadd.f32 %v778_v62, %v4410_v34  ;;  %1592 = vmatpush.bf16.msra.mxu1 %v3805_v31  ;;  %v810_v9 = vpop.f32.mrf.mxu0  ;;  %v662_v34 = vadd.f32 %v4419_v46, %v4346_v50  ;;  %v673_v26 = vpop.f32.mrf.mxu1  ;;  %v3842_v50 = vld [vmem:[#allocation4 + $0x2f0] sm:$0xff] }
 0x133   : > { %v4473_v40 = vadd.f32 %v4424_v49, %v843_v55  ;;  %1605 = vmatpush.bf16.msrb.mxu2 %v3813_v23  ;;  %2075 = vmatpush.bf16.msrb.mxu0 %v3863_v47  ;;  %v836_v1 = vadd.f32 %v810_v9, %v668_v28  ;;  %v3850_v46 = vld [vmem:[#allocation4 + $0x330] sm:$0xff]  ;;  %v642_v47 = vadd.f32 %v4437_v24, %v4340_v43  ;;  %v3840_v28 = vld [vmem:[#allocation4 + $0x2e0] sm:$0xff] }
 0x134   : > { %v4476_v6 = vadd.f32 %v4427_v59, %v844_v38  ;;  %1189 = vmatmul.bf16.vlgmr.msrb.gmra.mxu3 %v961_v51  ;;  %v830_v13 = vadd.f32 %v4447_v29, %v662_v34  ;;  %v3825_v29 = vld [vmem:[#allocation4 + $0x268] sm:$0xff]  ;;  %v3848_v51 = vld [vmem:[#allocation4 + $0x320] sm:$0xff]  ;;  %v674_v55 = vadd.f32 %v673_v26, %v4382_v33  ;;  %v3898_v38 = vld [vmem:[#allocation4 + $0x4b0] sm:$0xff] }
 0x135   : > { %v868_v4 = vadd.f32 %v4455_v25, %v836_v1  ;;  %1809 = vmatpush.bf16.msrb.mxu3 %v3827_v0  ;;  %v3839_v33 = vld [vmem:[#allocation4 + $0x2d8] sm:$0xff]  ;;  %v3822_v34 = vld [vmem:[#allocation4 + $0x250] sm:$0xff] }
 0x136   : > { %1593 = vmatpush.bf16.msra.mxu1 %v3804_v56  ;;  %v862_v35 = vadd.f32 %v4455_v25, %v830_v13  ;;  %v3846_v13 = vld [vmem:[#allocation4 + $0x310] sm:$0xff] }
 0x137   : > { %v892_v14 = vmax.f32 %v868_v4, 0.0  ;;  %1606 = vmatpush.bf16.msrb.mxu2 %v3812_v57  ;;  %2076 = vmatpush.bf16.msrb.mxu0 %v3862_v12  ;;  %v3847_v57 = vld [vmem:[#allocation4 + $0x318] sm:$0xff]  ;;  %v589_v12 = vadd.f32 %v4376_v22, %v4350_v53  ;;  %v671_v4 = vadd.f32 %v4465_v36, %v4374_v20  ;;  %v3845_v36 = vld [vmem:[#allocation4 + $0x308] sm:$0xff] }
 0x138   : > { %v740_v8 = vpop.f32.mrf.mxu2  ;;  %v886_v23 = vmax.f32 %v862_v35, 0.0 }
 0x139   : > { %v1379_v27 = vpack.c.bf16 %v892_v14, %v892_v14  ;;  %1810 = vmatpush.bf16.msrb.mxu3 %v3826_v5  ;;  %v846_v30 = vadd.f32 %v740_v8, %v4400_v11  ;;  %v781_v32 = vpop.f32.mrf.mxu3  ;;  %1594 = vmatmul.bf16.vlgmr.msra.gmra.mxu1 %v1378_v10  ;;  %v3849_v11 = vld [vmem:[#allocation4 + $0x328] sm:$0xff]  ;;  %v3838_v10 = vld [vmem:[#allocation4 + $0x2d0] sm:$0xff] }
 0x13a   : > { %1835 = vmatpush.bf16.msrb.mxu1 %v3843_v61  ;;  %v847_v39 = vadd.f32 %v781_v32, %v639_v44  ;;  %v813_v58 = vpop.f32.mrf.mxu0  ;;  %v676_v9 = vpop.f32.mrf.mxu1  ;;  %v910_v16 = vpack.c.bf16 %v886_v23, %v886_v23  ;;  %v3821_v44 = vld [vmem:[#allocation4 + $0x248] sm:$0xff] }
 0x13b   : > { %2045 = vmatpush.bf16.msra.mxu2 %v3851_v3  ;;  %v4487_v31 = vadd.f32 %v4424_v49, %v846_v30  ;;  %2077 = vmatpush.bf16.msrb.mxu0 %v3861_v17  ;;  %v3897_v3 = vld [vmem:[#allocation4 + $0x4a8] sm:$0xff]  ;;  %v677_v14 = vadd.f32 %v676_v9, %v4389_v54  ;;  %v839_v53 = vadd.f32 %v813_v58, %v671_v4  ;;  %v3896_v17 = vld [vmem:[#allocation4 + $0x4a0] sm:$0xff]  ;;  %v3871_v4 = vld [vmem:[#allocation4 + $0x3d8] sm:$0xff] }
 0x13c   : > { %1607 = vmatmul.bf16.vlgmr.msrb.gmra.mxu2 %v1379_v27  ;;  %v4490_v63 = vadd.f32 %v4427_v59, %v847_v39  ;;  %v3895_v27 = vld [vmem:[#allocation4 + $0x498] sm:$0xff]  ;;  %v3820_v30 = vld [vmem:[#allocation4 + $0x240] sm:$0xff] }
 0x13d   : > { %1811 = vmatpush.bf16.msrb.mxu3 %v3825_v29  ;;  %v3859_v29 = vld [vmem:[#allocation4 + $0x378] sm:$0xff]  ;;  %v3844_v39 = vld [vmem:[#allocation4 + $0x300] sm:$0xff] }
 0x13e   : > { %1836 = vmatpush.bf16.msrb.mxu1 %v3842_v50  ;;  %v3892_v9 = vld [vmem:[#allocation4 + $0x480] sm:$0xff] }
 0x13f   : > { %2046 = vmatpush.bf16.msra.mxu2 %v3850_v46  ;;  %2078 = vmatpush.bf16.msrb.mxu0 %v3860_v37  ;;  %v871_v46 = vadd.f32 %v4455_v25, %v839_v53  ;;  %v3894_v37 = vld [vmem:[#allocation4 + $0x490] sm:$0xff]  ;;  %v3853_v53 = vld [vmem:[#allocation4 + $0x348] sm:$0xff] }
 0x140   : > { %v743_v52 = vpop.f32.mrf.mxu2 }
 0x141   : > { %1812 = vmatpush.bf16.msrb.mxu3 %v3824_v45  ;;  %v849_v62 = vadd.f32 %v743_v52, %v601_v2  ;;  %v784_v0 = vpop.f32.mrf.mxu3  ;;  %v895_v35 = vmax.f32 %v871_v46, 0.0  ;;  %v3883_v45 = vld [vmem:[#allocation4 + $0x438] sm:$0xff]  ;;  %v3926_v46 = vld [vmem:[#allocation4 + $0x590] sm:$0xff] }
 0x142   : > { %1837 = vmatpush.bf16.msrb.mxu1 %v3841_v15  ;;  %v850_v56 = vadd.f32 %v784_v0, %v642_v47  ;;  %v816_v42 = vpop.f32.mrf.mxu0  ;;  %v679_v20 = vpop.f32.mrf.mxu1  ;;  %v896_v15 = vmax.f32 %v4459_v60, 0.0  ;;  %v3858_v47 = vld [vmem:[#allocation4 + $0x370] sm:$0xff]  ;;  %v3857_v0 = vld [vmem:[#allocation4 + $0x368] sm:$0xff] }
 0x143   : > { %2047 = vmatpush.bf16.msra.mxu2 %v3849_v11  ;;  %2517 = vmatpush.bf16.msra.mxu0 %v3899_v41  ;;  %v4498_v1 = vadd.f32 %v4424_v49, %v849_v62  ;;  %v842_v43 = vadd.f32 %v816_v42, %v674_v55  ;;  %v680_v58 = vadd.f32 %v679_v20, %v4397_v7  ;;  %v3875_v41 = vld [vmem:[#allocation4 + $0x3f8] sm:$0xff]  ;;  %v3893_v7 = vld [vmem:[#allocation4 + $0x488] sm:$0xff]  ;;  %v3874_v60 = vld [vmem:[#allocation4 + $0x3f0] sm:$0xff] }
 0x144   : > { %v4501_v24 = vadd.f32 %v4427_v59, %v850_v56  ;;  %1372 = vmatmul.bf16.vlgmr.msra.gmra.mxu3 %v910_v16  ;;  %v837_v59 = vadd.f32 %v4443_v48, %v589_v12  ;;  %v3837_v48 = vld [vmem:[#allocation4 + $0x2c8] sm:$0xff]  ;;  %v1615_v52 = vpack.c.bf16 %v895_v35, %v895_v35  ;;  %v1849_v55 = vpack.c.bf16 %v896_v15, %v896_v15  ;;  %v3882_v62 = vld [vmem:[#allocation4 + $0x430] sm:$0xff]  ;;  %v3868_v20 = vld [vmem:[#allocation4 + $0x3c0] sm:$0xff] }
 0x145   : > { %v874_v61 = vadd.f32 %v4455_v25, %v842_v43  ;;  %1813 = vmatpush.bf16.msrb.mxu3 %v3823_v21  ;;  %v902_v56 = vmax.f32 %v4487_v31, 0.0  ;;  %v3873_v21 = vld [vmem:[#allocation4 + $0x3e8] sm:$0xff]  ;;  %v3930_v31 = vld [vmem:[#allocation4 + $0x5b0] sm:$0xff] }
 0x146   : > { %1838 = vmatpush.bf16.msrb.mxu1 %v3840_v28  ;;  %v869_v8 = vadd.f32 %v4424_v49, %v837_v59  ;;  %v3836_v49 = vld [vmem:[#allocation4 + $0x2c0] sm:$0xff]  ;;  %v3881_v16 = vld [vmem:[#allocation4 + $0x428] sm:$0xff]  ;;  %v3879_v59 = vld [vmem:[#allocation4 + $0x418] sm:$0xff]  ;;  %v906_v15 = vmax.f32 %v4501_v24, 0.0 }
 0x147   : > { %2048 = vmatpush.bf16.msra.mxu2 %v3848_v51  ;;  %2518 = vmatpush.bf16.msra.mxu0 %v3898_v38  ;;  %v898_v5 = vmax.f32 %v874_v61, 0.0  ;;  %v2321_v61 = vpack.c.bf16 %v902_v56, %v902_v56  ;;  %v3914_v35 = vld [vmem:[#allocation4 + $0x530] sm:$0xff] }
 0x148   : > { %v893_v32 = vmax.f32 %v869_v8, 0.0  ;;  %v897_v8 = vmax.f32 %v4462_v19, 0.0  ;;  %v3886_v24 = vld [vmem:[#allocation4 + $0x450] sm:$0xff] }
 0x149   : > { %v1851_v22 = vpack.c.bf16 %v898_v5, %v898_v5  ;;  %1814 = vmatpush.bf16.msrb.mxu3 %v3822_v34  ;;  %v3855_v34 = vld [vmem:[#allocation4 + $0x358] sm:$0xff]  ;;  %v3929_v5 = vld [vmem:[#allocation4 + $0x5a8] sm:$0xff] }
 0x14a   : > { %1839 = vmatpush.bf16.msrb.mxu1 %v3839_v33  ;;  %v819_v26 = vpop.f32.mrf.mxu0  ;;  %v1613_v2 = vpack.c.bf16 %v893_v32, %v893_v32  ;;  %v682_v51 = vpop.f32.mrf.mxu1  ;;  %v3931_v33 = vld [vmem:[#allocation4 + $0x5b8] sm:$0xff] }
 0x14b   : > { %2049 = vmatpush.bf16.msra.mxu2 %v3847_v57  ;;  %2519 = vmatpush.bf16.msra.mxu0 %v3897_v3  ;;  %v845_v50 = vadd.f32 %v819_v26, %v677_v14  ;;  %v683_v38 = vadd.f32 %v682_v51, %v4404_v18  ;;  %v3856_v57 = vld [vmem:[#allocation4 + $0x360] sm:$0xff]  ;;  %v3927_v26 = vld [vmem:[#allocation4 + $0x598] sm:$0xff] }
 0x14c   : > { %2079 = vmatmul.bf16.vlgmr.msrb.gmra.mxu0 %v1851_v22  ;;  %v3872_v18 = vld [vmem:[#allocation4 + $0x3e0] sm:$0xff]  ;;  %v3869_v22 = vld [vmem:[#allocation4 + $0x3c8] sm:$0xff]  ;;  %v3907_v32 = vld [vmem:[#allocation4 + $0x4f8] sm:$0xff] }
 0x14d   : > { %v4513_v54 = vadd.f32 %v4455_v25, %v845_v50  ;;  %1815 = vmatpush.bf16.msrb.mxu3 %v3821_v44  ;;  %v3880_v3 = vld [vmem:[#allocation4 + $0x420] sm:$0xff]  ;;  %v3891_v50 = vld [vmem:[#allocation4 + $0x478] sm:$0xff] }
 0x14e   : > { %1840 = vmatpush.bf16.msrb.mxu1 %v3838_v10  ;;  %v3870_v10 = vld [vmem:[#allocation4 + $0x3d0] sm:$0xff]  ;;  %v3928_v14 = vld [vmem:[#allocation4 + $0x5a0] sm:$0xff]  ;;  %v3911_v51 = vld [vmem:[#allocation4 + $0x518] sm:$0xff] }
 0x14f   : > { %2050 = vmatpush.bf16.msra.mxu2 %v3846_v13  ;;  %2520 = vmatpush.bf16.msra.mxu0 %v3896_v17  ;;  %v3878_v13 = vld [vmem:[#allocation4 + $0x410] sm:$0xff]  ;;  %v3877_v17 = vld [vmem:[#allocation4 + $0x408] sm:$0xff]  ;;  %v3852_v44 = vld [vmem:[#allocation4 + $0x340] sm:$0xff]  ;;  %v901_v56 = vmax.f32 %v4513_v54, 0.0 }
 0x150   : > { %v3938_v54 = vld [vmem:[#allocation4 + $0x5f0] sm:$0xff] }
 0x151   : > { %1816 = vmatpush.bf16.msrb.mxu3 %v3820_v30  ;;  %v900_v30 = vmax.f32 %v4476_v6, 0.0  ;;  %v3924_v6 = vld [vmem:[#allocation4 + $0x580] sm:$0xff] }
 0x152   : > { %1841 = vmatpush.bf16.msrb.mxu1 %v3837_v48  ;;  %v822_v11 = vpop.f32.mrf.mxu0  ;;  %v899_v48 = vmax.f32 %v4473_v40, 0.0  ;;  %v3906_v40 = vld [vmem:[#allocation4 + $0x4f0] sm:$0xff] }
 0x153   : > { %2051 = vmatpush.bf16.msra.mxu2 %v3845_v36  ;;  %2521 = vmatpush.bf16.msra.mxu0 %v3895_v27  ;;  %v848_v23 = vadd.f32 %v822_v11, %v680_v58  ;;  %v3876_v36 = vld [vmem:[#allocation4 + $0x400] sm:$0xff]  ;;  %v1850_v27 = vpack.c.bf16 %v897_v8, %v897_v8  ;;  %v2086_v58 = vpack.c.bf16 %v900_v30, %v900_v30  ;;  %v3905_v11 = vld [vmem:[#allocation4 + $0x4e8] sm:$0xff] }
 0x154   : > { %1817 = vmatmul.bf16.vlgmr.msrb.gmra.mxu3 %v1613_v2  ;;  %v2085_v19 = vpack.c.bf16 %v899_v48, %v899_v48  ;;  %v2558_v2 = vpack.c.bf16 %v906_v15, %v906_v15  ;;  %v3933_v8 = vld [vmem:[#allocation4 + $0x5c8] sm:$0xff]  ;;  %v3916_v48 = vld [vmem:[#allocation4 + $0x540] sm:$0xff] }
 0x155   : > { %2058 = vmatpush.bf16.msra.mxu3 %v3859_v29  ;;  %v4518_v28 = vadd.f32 %v4455_v25, %v848_v23  ;;  %v3915_v29 = vld [vmem:[#allocation4 + $0x538] sm:$0xff]  ;;  %v3904_v23 = vld [vmem:[#allocation4 + $0x4e0] sm:$0xff] }
 0x156   : > { %1842 = vmatpush.bf16.msrb.mxu1 %v3836_v49  ;;  %v3890_v49 = vld [vmem:[#allocation4 + $0x470] sm:$0xff] }
 0x157   : > { %2052 = vmatpush.bf16.msra.mxu2 %v3844_v39  ;;  %2522 = vmatpush.bf16.msra.mxu0 %v3894_v37  ;;  %v3925_v39 = vld [vmem:[#allocation4 + $0x588] sm:$0xff] }
 0x158   : > { %v3889_v37 = vld [vmem:[#allocation4 + $0x468] sm:$0xff] }
 0x159   : > { %2059 = vmatpush.bf16.msra.mxu3 %v3858_v47  ;;  %1843 = vmatmul.bf16.vlgmr.msrb.gmra.mxu1 %v1615_v52  ;;  %v3912_v47 = vld [vmem:[#allocation4 + $0x520] sm:$0xff]  ;;  %v3887_v52 = vld [vmem:[#allocation4 + $0x458] sm:$0xff] }
 0x15a   : > { %2281 = vmatpush.bf16.msra.mxu1 %v3875_v41  ;;  %2053 = vmatmul.bf16.vlgmr.msra.gmra.mxu2 %v1849_v55  ;;  %v825_v42 = vpop.f32.mrf.mxu0  ;;  %v3913_v41 = vld [vmem:[#allocation4 + $0x528] sm:$0xff]  ;;  %v3902_v55 = vld [vmem:[#allocation4 + $0x4d0] sm:$0xff] }
 0x15b   : > { %2294 = vmatpush.bf16.msrb.mxu2 %v3883_v45  ;;  %2523 = vmatpush.bf16.msra.mxu0 %v3893_v7  ;;  %v851_v43 = vadd.f32 %v825_v42, %v683_v38  ;;  %v3888_v45 = vld [vmem:[#allocation4 + $0x460] sm:$0xff]  ;;  %v3903_v7 = vld [vmem:[#allocation4 + $0x4d8] sm:$0xff]  ;;  %v3909_v38 = vld [vmem:[#allocation4 + $0x508] sm:$0xff] }
 0x15c   : > { %v3923_v42 = vld [vmem:[#allocation4 + $0x578] sm:$0xff] }
 0x15d   : > { %2060 = vmatpush.bf16.msra.mxu3 %v3857_v0  ;;  %v4523_v12 = vadd.f32 %v4455_v25, %v851_v43  ;;  %v3854_v25 = vld [vmem:[#allocation4 + $0x350] sm:$0xff]  ;;  %v3901_v0 = vld [vmem:[#allocation4 + $0x4c8] sm:$0xff]  ;;  %v3908_v43 = vld [vmem:[#allocation4 + $0x500] sm:$0xff] }
 0x15e   : > { %2282 = vmatpush.bf16.msra.mxu1 %v3874_v60  ;;  %v3910_v60 = vld [vmem:[#allocation4 + $0x510] sm:$0xff] }
 0x15f   : > { %2295 = vmatpush.bf16.msrb.mxu2 %v3882_v62  ;;  %2524 = vmatpush.bf16.msra.mxu0 %v3892_v9  ;;  %v3885_v62 = vld [vmem:[#allocation4 + $0x448] sm:$0xff]  ;;  %v3884_v9 = vld [vmem:[#allocation4 + $0x440] sm:$0xff] }
 0x161   : > { %2061 = vmatpush.bf16.msra.mxu3 %v3856_v57  ;;  %v2087_v57 = vpack.c.bf16 %v901_v56, %v901_v56 }
 0x162   : > { %2283 = vmatpush.bf16.msra.mxu1 %v3873_v21  ;;  %2525 = vmatmul.bf16.vlgmr.msra.gmra.mxu0 %v2321_v61  ;;  %v3900_v21 = vld [vmem:[#allocation4 + $0x4c0] sm:$0xff]  ;;  %v904_v61 = vmax.f32 %v4518_v28, 0.0 }
 0x163   : > { %2296 = vmatpush.bf16.msrb.mxu2 %v3881_v16  ;;  %2766 = vmatpush.bf16.msrb.mxu0 %v3931_v33  ;;  %v903_v16 = vmax.f32 %v4490_v63, 0.0  ;;  %v3939_v33 = vld [vmem:[#allocation4 + $0x5f8] sm:$0xff]  ;;  %v3937_v63 = vld [vmem:[#allocation4 + $0x5e8] sm:$0xff]  ;;  %v3936_v28 = vld [vmem:[#allocation4 + $0x5e0] sm:$0xff] }
 0x165   : > { %2062 = vmatpush.bf16.msra.mxu3 %v3855_v34  ;;  %v3921_v34 = vld [vmem:[#allocation4 + $0x568] sm:$0xff] }
 0x166   : > { %2284 = vmatpush.bf16.msra.mxu1 %v3872_v18  ;;  %v3922_v18 = vld [vmem:[#allocation4 + $0x570] sm:$0xff] }
 0x167   : > { %2297 = vmatpush.bf16.msrb.mxu2 %v3880_v3  ;;  %2767 = vmatpush.bf16.msrb.mxu0 %v3930_v31  ;;  %v2322_v3 = vpack.c.bf16 %v903_v16, %v903_v16  ;;  %v2323_v31 = vpack.c.bf16 %v904_v61, %v904_v61 }
 0x169   : > { %2063 = vmatpush.bf16.msra.mxu3 %v3854_v25 }
 0x16a   : > { %2285 = vmatpush.bf16.msra.mxu1 %v3871_v4 }
 0x16b   : > { %2298 = vmatpush.bf16.msrb.mxu2 %v3879_v59  ;;  %2768 = vmatpush.bf16.msrb.mxu0 %v3929_v5  ;;  %v3920_v59 = vld [vmem:[#allocation4 + $0x560] sm:$0xff]  ;;  %v3919_v5 = vld [vmem:[#allocation4 + $0x558] sm:$0xff] }
 0x16d   : > { %2064 = vmatpush.bf16.msra.mxu3 %v3853_v53 }
 0x16e   : > { %2286 = vmatpush.bf16.msra.mxu1 %v3870_v10  ;;  %v3935_v10 = vld [vmem:[#allocation4 + $0x5d8] sm:$0xff] }
 0x16f   : > { %2299 = vmatpush.bf16.msrb.mxu2 %v3878_v13  ;;  %2769 = vmatpush.bf16.msrb.mxu0 %v3928_v14 }
 0x171   : > { %2065 = vmatpush.bf16.msra.mxu3 %v3852_v44 }
 0x172   : > { %2287 = vmatpush.bf16.msra.mxu1 %v3869_v22  ;;  %v3918_v22 = vld [vmem:[#allocation4 + $0x550] sm:$0xff] }
 0x173   : > { %2300 = vmatpush.bf16.msrb.mxu2 %v3877_v17  ;;  %2770 = vmatpush.bf16.msrb.mxu0 %v3927_v26  ;;  %v3934_v17 = vld [vmem:[#allocation4 + $0x5d0] sm:$0xff]  ;;  %v3917_v26 = vld [vmem:[#allocation4 + $0x548] sm:$0xff] }
 0x174   : > { %2066 = vmatmul.bf16.vlgmr.msra.gmra.mxu3 %v1850_v27  ;;  %v907_v27 = vmax.f32 %v4523_v12, 0.0 }
 0x175   : > { %2307 = vmatpush.bf16.msrb.mxu3 %v3891_v50 }
 0x176   : > { %2288 = vmatpush.bf16.msra.mxu1 %v3868_v20 }
 0x177   : > { %2301 = vmatpush.bf16.msrb.mxu2 %v3876_v36  ;;  %2771 = vmatpush.bf16.msrb.mxu0 %v3926_v46  ;;  %v905_v36 = vmax.f32 %v4498_v1, 0.0  ;;  %v3932_v46 = vld [vmem:[#allocation4 + $0x5c0] sm:$0xff] }
 0x179   : > { %2308 = vmatpush.bf16.msrb.mxu3 %v3890_v49  ;;  %2289 = vmatmul.bf16.vlgmr.msra.gmra.mxu1 %v2085_v19  ;;  %v2557_v30 = vpack.c.bf16 %v905_v36, %v905_v36 }
 0x17a   : > { %2530 = vmatpush.bf16.msrb.mxu1 %v3907_v32  ;;  %2302 = vmatmul.bf16.vlgmr.msrb.gmra.mxu2 %v2086_v58 }
 0x17b   : > { %2543 = vmatpush.bf16.msra.mxu2 %v3915_v29  ;;  %2772 = vmatpush.bf16.msrb.mxu0 %v3925_v39  ;;  %v2559_v29 = vpack.c.bf16 %v907_v27, %v907_v27 }
 0x17d   : > { %2309 = vmatpush.bf16.msrb.mxu3 %v3889_v37 }
 0x17e   : > { %2531 = vmatpush.bf16.msrb.mxu1 %v3906_v40 }
 0x17f   : > { %2544 = vmatpush.bf16.msra.mxu2 %v3914_v35  ;;  %2773 = vmatpush.bf16.msrb.mxu0 %v3924_v6 }
 0x181   : > { %2310 = vmatpush.bf16.msrb.mxu3 %v3888_v45 }
 0x182   : > { %2532 = vmatpush.bf16.msrb.mxu1 %v3905_v11  ;;  %2774 = vmatmul.bf16.vlgmr.msrb.gmra.mxu0 %v2558_v2 }
 0x183   : > { %2545 = vmatpush.bf16.msra.mxu2 %v3913_v41 }
 0x185   : > { %2311 = vmatpush.bf16.msrb.mxu3 %v3887_v52 }
 0x186   : > { %2533 = vmatpush.bf16.msrb.mxu1 %v3904_v23 }
 0x187   : > { %2546 = vmatpush.bf16.msra.mxu2 %v3912_v47 }
 0x189   : > { %2312 = vmatpush.bf16.msrb.mxu3 %v3886_v24 }
 0x18a   : > { %2534 = vmatpush.bf16.msrb.mxu1 %v3903_v7 }
 0x18b   : > { %2547 = vmatpush.bf16.msra.mxu2 %v3911_v51 }
 0x18d   : > { %2313 = vmatpush.bf16.msrb.mxu3 %v3885_v62 }
 0x18e   : > { %2535 = vmatpush.bf16.msrb.mxu1 %v3902_v55 }
 0x18f   : > { %2548 = vmatpush.bf16.msra.mxu2 %v3910_v60 }
 0x191   : > { %2314 = vmatpush.bf16.msrb.mxu3 %v3884_v9 }
 0x192   : > { %2536 = vmatpush.bf16.msrb.mxu1 %v3901_v0 }
 0x193   : > { %2549 = vmatpush.bf16.msra.mxu2 %v3909_v38 }
 0x194   : > { %2315 = vmatmul.bf16.vlgmr.msrb.gmra.mxu3 %v2087_v57 }
 0x195   : > { %2753 = vmatpush.bf16.msra.mxu3 %v3923_v42 }
 0x196   : > { %2537 = vmatpush.bf16.msrb.mxu1 %v3900_v21  ;;  %v1164_v4 = vpop.f32.mrf.mxu1 }
 0x197   : > { %2550 = vmatpush.bf16.msra.mxu2 %v3908_v43 }
 0x199   : > { %2754 = vmatpush.bf16.msra.mxu3 %v3922_v18  ;;  %2538 = vmatmul.bf16.vlgmr.msrb.gmra.mxu1 %v2322_v3 }
 0x19a   : > { %2779 = vmatpush.bf16.msra.mxu1 %v3939_v33  ;;  %2551 = vmatmul.bf16.vlgmr.msra.gmra.mxu2 %v2323_v31 }
 0x19d   : > { %2755 = vmatpush.bf16.msra.mxu3 %v3921_v34  ;;  %v1177_v25 = vpop.f32.mrf.mxu2 }
 0x19e   : > { %2780 = vmatpush.bf16.msra.mxu1 %v3938_v54  ;;  %v1178_v13 = vadd.f32 %v1177_v25, %v1164_v4  ;;  %v1166_v14 = vpop.f32.mrf.mxu1  ;;  %v1582_v53 = vpop.f32.mrf.mxu0 }
 0x1a1   : > { %2756 = vmatpush.bf16.msra.mxu3 %v3920_v59 }
 0x1a2   : > { %2781 = vmatpush.bf16.msra.mxu1 %v3937_v63 }
 0x1a5   : > { %2757 = vmatpush.bf16.msra.mxu3 %v3919_v5  ;;  %v1179_v44 = vpop.f32.mrf.mxu2 }
 0x1a6   : > { %2782 = vmatpush.bf16.msra.mxu1 %v3936_v28  ;;  %v1347_v50 = vpop.f32.mrf.mxu1  ;;  %v1584_v20 = vpop.f32.mrf.mxu0 }
 0x1a9   : > { %2758 = vmatpush.bf16.msra.mxu3 %v3918_v22 }
 0x1aa   : > { %2783 = vmatpush.bf16.msra.mxu1 %v3935_v10 }
 0x1ad   : > { %2759 = vmatpush.bf16.msra.mxu3 %v3917_v26  ;;  %v1360_v32 = vpop.f32.mrf.mxu2 }
 0x1ae   : > { %2784 = vmatpush.bf16.msra.mxu1 %v3934_v17  ;;  %v1349_v49 = vpop.f32.mrf.mxu1  ;;  %v1831_v19 = vpop.f32.mrf.mxu0 }
 0x1b1   : > { %2760 = vmatpush.bf16.msra.mxu3 %v3916_v48 }
 0x1b2   : > { %2785 = vmatpush.bf16.msra.mxu1 %v3933_v8 }
 0x1b4   : > { %2761 = vmatmul.bf16.vlgmr.msra.gmra.mxu3 %v2557_v30 }
 0x1b5   : > { %v1362_v39 = vpop.f32.mrf.mxu2 }
 0x1b6   : > { %2786 = vmatpush.bf16.msra.mxu1 %v3932_v46  ;;  %v1595_v58 = vpop.f32.mrf.mxu1  ;;  %v1833_v40 = vpop.f32.mrf.mxu0  ;;  %v3981_v46 = vld [vmem:[%s4559_s4] ss:$0 sm:$0xff] }
 0x1b7   : > { %v1190_v35 = vpop.f32.mrf.mxu3  ;;  %v1596_v37 = vadd.f32 %v1595_v58, %v1582_v53  ;;  %v3983_v58 = vld [vmem:[#allocation2] ss:$0 sm:$0xff] }
 0x1b8   : > { %v1191_v6 = vadd.f32 %v1190_v35, %v1178_v13 }
 0x1b9   : > { %2787 = vmatmul.bf16.vlgmr.msra.gmra.mxu1 %v2559_v29  ;;  %v3982_v29 = vld [vmem:[%s4560_s5] ss:$0 sm:$0xff] }
 0x1ba   : > { %v1348_v1 = vadd.f32 %v1347_v50, %v1191_v6 }
 0x1bc   : > { %v1361_v15 = vadd.f32 %v1360_v32, %v1348_v1 }
 0x1be   : > { %v1597_v11 = vpop.f32.mrf.mxu1 }
 0x1bf   : > { %v1608_v41 = vpop.f32.mrf.mxu2  ;;  %v1192_v12 = vpop.f32.mrf.mxu3 }
 0x1c0   : > { %v1609_v45 = vadd.f32 %v1608_v41, %v1596_v37 }
 0x1c7   : > { %v1610_v2 = vpop.f32.mrf.mxu2  ;;  %v1373_v23 = vpop.f32.mrf.mxu3 }
 0x1c8   : > { %v1374_v52 = vadd.f32 %v1373_v23, %v1361_v15 }
 0x1c9   : > { %v2080_v47 = vpop.f32.mrf.mxu0 }
 0x1ca   : > { %v1612_v7 = vadd.f32 %v1609_v45, %v1374_v52 }
 0x1cf   : > { %v1375_v51 = vpop.f32.mrf.mxu3 }
 0x1d1   : > { %v2082_v24 = vpop.f32.mrf.mxu0 }
 0x1d6   : > { %v1844_v55 = vpop.f32.mrf.mxu1 }
 0x1d7   : > { %v1818_v60 = vpop.f32.mrf.mxu3 }
 0x1d8   : > { %v1832_v62 = vadd.f32 %v1831_v19, %v1818_v60 }
 0x1da   : > { %v1845_v0 = vadd.f32 %v1844_v55, %v1832_v62 }
 0x1dc   : > { %v1848_v56 = vadd.f32 %v1845_v0, %v1612_v7 }
 0x1dd   : > { %v2054_v38 = vpop.f32.mrf.mxu2 }
 0x1de   : > { %v1846_v9 = vpop.f32.mrf.mxu1 }
 0x1df   : > { %v2526_v42 = vpop.f32.mrf.mxu0  ;;  %v1820_v21 = vpop.f32.mrf.mxu3 }
 0x1e5   : > { %v2056_v16 = vpop.f32.mrf.mxu2 }
 0x1e7   : > { %v2528_v43 = vpop.f32.mrf.mxu0 }
 0x1f6   : > { %v2290_v33 = vpop.f32.mrf.mxu1 }
 0x1f7   : > { %v2067_v57 = vpop.f32.mrf.mxu3 }
 0x1f8   : > { %v2068_v61 = vadd.f32 %v2067_v57, %v2054_v38 }
 0x1fa   : > { %v2081_v18 = vadd.f32 %v2080_v47, %v2068_v61 }
 0x1fc   : > { %v2084_v31 = vadd.f32 %v2081_v18, %v1848_v56 }
 0x1fd   : > { %v2303_v3 = vpop.f32.mrf.mxu2 }
 0x1fe   : > { %v2292_v54 = vpop.f32.mrf.mxu1  ;;  %v2304_v5 = vadd.f32 %v2303_v3, %v2290_v33 }
 0x1ff   : > { %v2775_v34 = vpop.f32.mrf.mxu0  ;;  %v2069_v63 = vpop.f32.mrf.mxu3 }
 0x205   : > { %v2305_v4 = vpop.f32.mrf.mxu2 }
 0x207   : > { %v2777_v59 = vpop.f32.mrf.mxu0 }
 0x216   : > { %v2539_v28 = vpop.f32.mrf.mxu1 }
 0x217   : > { %v2316_v25 = vpop.f32.mrf.mxu3  ;;  %v2540_v13 = vadd.f32 %v2539_v28, %v2526_v42 }
 0x218   : > { %v2317_v10 = vadd.f32 %v2316_v25, %v2304_v5 }
 0x21a   : > { %v2320_v14 = vadd.f32 %v2317_v10, %v2084_v31 }
 0x21d   : > { %v2552_v53 = vpop.f32.mrf.mxu2 }
 0x21e   : > { %v2553_v22 = vadd.f32 %v2552_v53, %v2540_v13  ;;  %v2541_v17 = vpop.f32.mrf.mxu1 }
 0x21f   : > { %v2318_v44 = vpop.f32.mrf.mxu3 }
 0x220   : > { %v2556_v26 = vadd.f32 %v2553_v22, %v2320_v14 }
 0x225   : > { %v2554_v8 = vpop.f32.mrf.mxu2 }
 0x236   : > { %v2788_v50 = vpop.f32.mrf.mxu1 }
 0x237   : > { %v2762_v20 = vpop.f32.mrf.mxu3 }
 0x238   : > { %v2776_v48 = vadd.f32 %v2775_v34, %v2762_v20 }
 0x23a   : > { %v2789_v36 = vadd.f32 %v2788_v50, %v2776_v48 }
 0x23c   : > { %v2792_v30 = vadd.f32 %v2789_v36, %v2556_v26 }
 0x23e   : > { %v2790_v27 = vpop.f32.mrf.mxu1  ;;  %v2797_v32 = vadd.f32 %v3981_v46, %v2792_v30 }
 0x23f   : > { %v2764_v49 = vpop.f32.mrf.mxu3 }
 0x240   : > { %v2798_v19 = vmax.f32 %v2797_v32, 0.0 }
 0x242   : > { %v2803_v39 = vmul.f32 %v3982_v29, %v2798_v19 }
 0x244   : > { %2804 = vadd.xlane.f32.xlu0 %v2803_v39 }
 0x2b7   : > { %v2805_v40 = vpop.xlane.xlu0 %2804 }
 0x2b8   : > { %v2810_v35 = vadd.f32 %v3983_v58, %v2805_v40 }
 0x2ba   : > { %2812 = vst.msk [vmem:[%s366_s12] sm:$0xff] %vm2811_vm2, %v2810_v35 }
 0x2bb PF: > { %p17_p12 = scmp.ge.s32.totalorder %s4107_s29, 4   ;;  %s4565_s26 = smov %s4036_s27 }
 0x2bc   : > { %s4566_s27 = smov %s4117_s9  ;;  %s4567_s28 = smov %s4107_s29 }
 0x2bd   :  { %19 = sbr.rel (!%p17_p12) target bundleno = 5 (0x5), region = 138 }
 0x2c2   :  { %2832 = vsyncpa [#allocation5], 1 }
 0x2c3   :  { %2834 = vsyncpa [#allocation5 + $0x1], 1 }

</bundles_post_ra>
